<compile_context>
chip_gen: v7x
topology: tpu7x:2x2x1
jax: 0.10.0
libtpu: 0.0.40
codegen_flags: <defaults>
</compile_context>

<pallas_src>
import math
import functools

import numpy as np
import jax
import jax.numpy as jnp
from jax import lax
from jax.experimental import pallas as pl
from jax.experimental.pallas import tpu as pltpu

# ---------------- deterministic synthetic config ----------------------------
DELTA = 0.5
NUM_VERTS = 64            # G * G
TASK_IMG_SIZE = 16


def image2graph(num_verts):
    """Regular G x G grid graph (deterministic stand-in for image2graph)."""
    g = int(math.isqrt(num_verts))
    idx = np.arange(num_verts).reshape(g, g)
    src = np.concatenate([idx[:, :-1].ravel(), idx[:-1, :].ravel()])
    dst = np.concatenate([idx[:, 1:].ravel(), idx[1:, :].ravel()])
    e0 = np.concatenate([src, dst]).astype(np.int32)     # both directions listed
    e1 = np.concatenate([dst, src]).astype(np.int32)
    edges = np.stack([e0, e1], axis=1)                   # (E, 2)
    cols, rows = np.meshgrid(np.arange(g), np.arange(g))
    verts = np.stack([cols.ravel(), rows.ravel()], 1).astype(np.float64)  # (V, 2) = (x, y)
    return verts, edges


def _upsample_matrix_np(T, G):
    """Row-interpolation matrix for bilinear Upsample with align_corners=True."""
    if T == 1:
        src = np.zeros((1,), np.float64)
    else:
        src = np.arange(T, dtype=np.float64) * (G - 1) / (T - 1)
    i0 = np.clip(np.floor(src).astype(np.int64), 0, G - 1)
    i1 = np.minimum(i0 + 1, G - 1)
    frac = src - i0
    U = np.zeros((T, G), np.float64)
    U[np.arange(T), i0] += 1.0 - frac
    U[np.arange(T), i1] += frac
    return U


def build_warper_constants(num_verts, task_img_size, delta):
    """All data-independent tensors, computed once on the host (module init)."""
    verts, edges = image2graph(num_verts)
    V = num_verts
    G = int(math.isqrt(V))
    T = task_img_size
    e0, e1 = edges[:, 0], edges[:, 1]

    adj = np.zeros((V, V), np.float64)
    adj[e0, e1] = 1.0

    def per_axis(dim):
        vdim = verts[:, dim]
        diff = vdim[:, None] - vdim[None, :]              # v_i - v_j
        denom = (diff + 100.0) ** 2                       # faithful to reference formula
        a = adj * (-2.0 / denom)
        A = a + np.diag(-a.sum(axis=1))                   # eq. 5 A (data independent)
        coef = 2.0 * diff / denom
        # Fold the dense-S (to_dense_adj) construction algebraically:
        #   B[b, i] = sum_j 2*S[b,i,j]*diff[i,j]/denom[i,j]
        #           = bconst[i] + 0.5*(delta-1) * sum_v sal[b, v] * K[i, v]
        # with S[b,i,j] = delta*es + (1-es) on edges, es = (sal[e0]+sal[e1])/2.
        c_e = coef[e0, e1]                                # per-directed-edge coefficient
        bconst = np.zeros(V, np.float64)
        np.add.at(bconst, e0, c_e)
        K = np.zeros((V, V), np.float64)
        np.add.at(K, (e0, e0), c_e)
        np.add.at(K, (e0, e1), c_e)
        KT = (0.5 * (delta - 1.0)) * K.T                  # so B_row = bconst + sal @ KT
        # Fold torch.linalg.solve(A, B):  v_row = B_row @ A^{-T}.
        # TODO(synk): A is exactly singular (rows sum to 0, Laplacian-like), so the
        # reference's LU solve is numerically ill-posed; we use the float64
        # pseudo-inverse (min-norm solution).  The downstream mean-subtraction is
        # invariant to the nullspace (constant) component for any consistent solution.
        AinvT = np.linalg.pinv(A).T
        return KT @ AinvT, bconst @ AinvT

    Wx, cx = per_axis(0)
    Wy, cy = per_axis(1)
    W_blk = np.zeros((2 * V, 2 * V), np.float64)
    W_blk[:V, :V] = Wx
    W_blk[V:, V:] = Wy
    c_cat = np.concatenate([cx, cy])[None, :]             # (1, 2V)

    U = _upsample_matrix_np(T, G)                          # (T, G)
    MT = np.kron(U, U).T                                   # (G*G, T*T)

    return dict(
        W_blk=jnp.asarray(W_blk, dtype=jnp.float32),       # (2V, 2V) block-diag, solve folded
        c_cat=jnp.asarray(c_cat, dtype=jnp.float32),       # (1, 2V)
        MT=jnp.asarray(MT, dtype=jnp.float32),             # (G*G, T*T)
        T=T, G=G,
    )


# ---------------- single fused Pallas kernel --------------------------------
def _fused_warper_kernel(sal_ref, wblk_ref, ccat_ref, mT_ref, img_ref, out_ref,
                         *, V, H, W):
    # sal: (1, 2V); wblk: (2V, 2V); ccat: (1, 2V); mT: (G*G, T*T);
    # img: (C, H*W); out: (C, T*T)
    TT = mT_ref.shape[1]
    HW = img_ref.shape[1]

    # --- vertex displacements: one 128-lane MXU matmul (solve pre-folded) ----
    v = ccat_ref[...] + jnp.dot(sal_ref[...], wblk_ref[...],
                                preferred_element_type=jnp.float32)    # (1, 2V) = [vx | vy]
    vx = v[:, :V]
    vy = v[:, V:]
    vx = vx - jnp.mean(vx, axis=-1, keepdims=True)
    vy = vy - jnp.mean(vy, axis=-1, keepdims=True)
    sx = jnp.max(jnp.abs(vx), axis=-1, keepdims=True)                  # (1, 1)
    sy = jnp.max(jnp.abs(vy), axis=-1, keepdims=True)
    # reference divides unguarded; guard only differs for a degenerate
    # all-constant displacement field (where the reference would emit NaN)
    scale = jnp.maximum(jnp.maximum(sx, sy), 1e-12)
    inv_scale = 1.0 / scale
    gx = jnp.clip(vx * inv_scale, -1.0, 1.0)                           # (1, V)
    gy = jnp.clip(vy * inv_scale, -1.0, 1.0)

    # --- bilinear upsample of the coarse grid (align_corners=True), MXU ------
    g2 = jnp.concatenate([gx, gy], axis=0)                             # (2, V)
    g_up = jnp.dot(g2, mT_ref[...], preferred_element_type=jnp.float32)  # (2, TT)

    # --- grid_sample: bilinear, padding_mode='zeros', align_corners=False ----
    ix = ((g_up[0:1, :] + 1.0) * W - 1.0) * 0.5                        # (1, TT)
    iy = ((g_up[1:2, :] + 1.0) * H - 1.0) * 0.5
    x0f = jnp.floor(ix)
    y0f = jnp.floor(iy)
    wx1 = ix - x0f
    wx0 = 1.0 - wx1
    wy1 = iy - y0f
    wy0 = 1.0 - wy1
    x0 = x0f.astype(jnp.int32)
    x1 = x0 + 1
    y0 = y0f.astype(jnp.int32)
    y1 = y0 + 1

    # fused sampling matrix S[(y*W + x), t] = Wy[y, t] * Wx[x, t]
    # (out-of-bounds corners match no row -> zero padding, like grid_sample)
    r = lax.broadcasted_iota(jnp.int32, (HW, TT), 0)
    if (W & (W - 1)) == 0:                        # power of two: shift/mask
        yi = jnp.right_shift(r, W.bit_length() - 1)
        xi = jnp.bitwise_and(r, W - 1)
    else:
        yi = r // W
        xi = r - yi * W
    wgt_x = jnp.where(xi == x0, wx0, 0.0) + jnp.where(xi == x1, wx1, 0.0)  # (HW, TT)
    wgt_y = jnp.where(yi == y0, wy0, 0.0) + jnp.where(yi == y1, wy1, 0.0)
    smat = wgt_x * wgt_y                                               # (HW, TT)

    # one K=256 lane-dense MXU matmul + one unmasked lane-dense (C, TT) store
    out_ref[...] = jnp.dot(img_ref[...], smat,
                           preferred_element_type=jnp.float32).astype(out_ref.dtype)


def spatial_warper_forward(img, verts_saliency_x, verts_saliency_y, consts):
    B, C, H, W = img.shape
    V = verts_saliency_x.shape[1]
    T, G = consts["T"], consts["G"]
    TT = T * T
    HW = H * W

    sal_cat = jnp.concatenate(
        [verts_saliency_x, verts_saliency_y], axis=-1
    ).astype(jnp.float32).reshape(B, 1, 2 * V)                    # (B, 1, 2V)
    img_flat = img.reshape(B, C, HW).astype(jnp.float32)          # (B, C, H*W), free reshape

    kernel = functools.partial(_fused_warper_kernel, V=V, H=H, W=W)
    grid_spec = pltpu.PrefetchScalarGridSpec(
        num_scalar_prefetch=0,
        grid=(B,),
        in_specs=[
            pl.BlockSpec((None, 1, 2 * V), lambda b: (b, 0, 0)),   # per-batch saliency
            pl.BlockSpec((2 * V, 2 * V), lambda b: (0, 0)),        # block-diag solve matrix
            pl.BlockSpec((1, 2 * V), lambda b: (0, 0)),            # constant offset
            pl.BlockSpec((G * G, TT), lambda b: (0, 0)),           # kron'd upsample matrix
            pl.BlockSpec((None, C, HW), lambda b: (b, 0, 0)),      # per-batch image
        ],
        out_specs=pl.BlockSpec((None, C, TT), lambda b: (b, 0, 0)),
    )
    out = pl.pallas_call(
        kernel,
        out_shape=jax.ShapeDtypeStruct((B, C, TT), jnp.float32),
        grid_spec=grid_spec,
        compiler_params=pltpu.CompilerParams(dimension_semantics=("parallel",)),
    )(sal_cat, consts["W_blk"], consts["c_cat"], consts["MT"], img_flat)
    return out.reshape(B, C, T, T)


# ---------------- pure-JAX reference (same folded constants) ----------------
def spatial_warper_reference(img, verts_saliency_x, verts_saliency_y, consts):
    B, C, H, W = img.shape
    V = verts_saliency_x.shape[1]
    T = consts["T"]
    sal = jnp.concatenate([verts_saliency_x, verts_saliency_y], -1).astype(jnp.float32)
    v = consts["c_cat"] + jnp.matmul(sal, consts["W_blk"], precision="highest")
    vx, vy = v[:, :V], v[:, V:]
    vx = vx - vx.mean(axis=1, keepdims=True)
    vy = vy - vy.mean(axis=1, keepdims=True)
    scale = jnp.maximum(
        jnp.maximum(jnp.max(jnp.abs(vx), axis=1, keepdims=True),
                    jnp.max(jnp.abs(vy), axis=1, keepdims=True)), 1e-12)
    gx = jnp.clip(vx / scale, -1.0, 1.0)
    gy = jnp.clip(vy / scale, -1.0, 1.0)
    gx_up = jnp.matmul(gx, consts["MT"], precision="highest")     # (B, TT)
    gy_up = jnp.matmul(gy, consts["MT"], precision="highest")
    ix = ((gx_up + 1.0) * W - 1.0) * 0.5
    iy = ((gy_up + 1.0) * H - 1.0) * 0.5
    x0 = jnp.floor(ix)
    y0 = jnp.floor(iy)
    wx1 = ix - x0
    wy1 = iy - y0
    img_f = img.astype(jnp.float32)

    def corner(xc, yc, wgt):
        valid = ((xc >= 0) & (xc < W) & (yc >= 0) & (yc < H)).astype(jnp.float32)
        xi = jnp.clip(xc, 0, W - 1).astype(jnp.int32)
        yi = jnp.clip(yc, 0, H - 1).astype(jnp.int32)
        vals = jax.vmap(lambda im, yy, xx: im[:, yy, xx])(img_f, yi, xi)  # (B, C, TT)
        return vals * (wgt * valid)[:, None, :]

    out = (corner(x0, y0, (1.0 - wx1) * (1.0 - wy1))
           + corner(x0 + 1.0, y0, wx1 * (1.0 - wy1))
           + corner(x0, y0 + 1.0, (1.0 - wx1) * wy1)
           + corner(x0 + 1.0, y0 + 1.0, wx1 * wy1))
    return out.reshape(B, C, T, T)


# ---------------- demo -------------------------------------------------------
if __name__ == "__main__":
    key = jax.random.PRNGKey(0)
    B, C, H, W = 2, 4, 16, 16

    consts = build_warper_constants(NUM_VERTS, TASK_IMG_SIZE, DELTA)

    k1, k2, k3 = jax.random.split(key, 3)
    img = jax.random.normal(k1, (B, C, H, W), dtype=jnp.float32)
    verts_saliency_x = jax.random.uniform(k2, (B, NUM_VERTS), dtype=jnp.float32)
    verts_saliency_y = jax.random.uniform(k3, (B, NUM_VERTS), dtype=jnp.float32)

    out = spatial_warper_forward(img, verts_saliency_x, verts_saliency_y, consts)
    out = jax.block_until_ready(out)
    assert out.shape == (B, C, TASK_IMG_SIZE, TASK_IMG_SIZE), out.shape

    ref = jax.block_until_ready(
        spatial_warper_reference(img, verts_saliency_x, verts_saliency_y, consts))
    np.testing.assert_allclose(np.asarray(out), np.asarray(ref), atol=5e-3, rtol=5e-3)
    print("KERNEL_OK")
</pallas_src>

<mosaic_0001>
module attributes {stable_mosaic.version = 11 : i64} {
  func.func @_fused_warper_kernel(%arg0: i32, %arg1: memref<1x1x128xf32, #tpu.memory_space<vmem>>, %arg2: memref<128x128xf32, #tpu.memory_space<vmem>>, %arg3: memref<1x128xf32, #tpu.memory_space<vmem>>, %arg4: memref<64x256xf32, #tpu.memory_space<vmem>>, %arg5: memref<1x4x256xf32, #tpu.memory_space<vmem>>, %arg6: memref<1x4x256xf32, #tpu.memory_space<vmem>>) attributes {dimension_semantics = [#tpu.dimension_semantics<parallel>], iteration_bounds = array<i64: 2>, scalar_prefetch = 0 : i64, scratch_operands = 0 : i64, tpu.core_type = #tpu.core_type<tc>, window_params = [{transform_indices = @transform_0, window_bounds = array<i64: 1, 1, 128>}, {pipeline_mode = #tpu.pipeline_mode<synchronous>, transform_indices = @transform_1, window_bounds = array<i64: 128, 128>}, {pipeline_mode = #tpu.pipeline_mode<synchronous>, transform_indices = @transform_2, window_bounds = array<i64: 1, 128>}, {pipeline_mode = #tpu.pipeline_mode<synchronous>, transform_indices = @transform_3, window_bounds = array<i64: 64, 256>}, {transform_indices = @transform_4, window_bounds = array<i64: 1, 4, 256>}, {transform_indices = @transform_5, window_bounds = array<i64: 1, 4, 256>}]} {
    %c0 = arith.constant 0 : index
    %c0_0 = arith.constant 0 : index
    %0 = vector.load %arg3[%c0, %c0_0] : memref<1x128xf32, #tpu.memory_space<vmem>>, vector<1x128xf32>
    %c0_1 = arith.constant 0 : index
    %c0_2 = arith.constant 0 : index
    %c0_3 = arith.constant 0 : index
    %1 = vector.load %arg1[%c0_1, %c0_2, %c0_3] : memref<1x1x128xf32, #tpu.memory_space<vmem>>, vector<1x1x128xf32>
    %2 = vector.shape_cast %1 : vector<1x1x128xf32> to vector<1x128xf32>
    %c0_4 = arith.constant 0 : index
    %c0_5 = arith.constant 0 : index
    %3 = vector.load %arg2[%c0_4, %c0_5] : memref<128x128xf32, #tpu.memory_space<vmem>>, vector<128x128xf32>
    %cst = arith.constant dense<0.000000e+00> : vector<1x128xf32>
    %4 = tpu.matmul %2, %3, %cst {dimension_numbers = #tpu.dot_dimension_numbers<[1], [0], [0], [1], [0, 0, 1, 1], [], []>} : vector<1x128xf32>, vector<128x128xf32>, vector<1x128xf32> -> vector<1x128xf32>
    %5 = arith.addf %0, %4 : vector<1x128xf32>
    %6 = vector.extract_strided_slice %5 {offsets = [0, 0], sizes = [1, 64], strides = [1, 1]} : vector<1x128xf32> to vector<1x64xf32>
    %7 = vector.extract_strided_slice %5 {offsets = [0, 64], sizes = [1, 64], strides = [1, 1]} : vector<1x128xf32> to vector<1x64xf32>
    %cst_6 = arith.constant dense<0.000000e+00> : vector<1xf32>
    %8 = vector.multi_reduction <add>, %6, %cst_6 [1] : vector<1x64xf32> to vector<1xf32>
    %9 = vector.shape_cast %8 : vector<1xf32> to vector<1x1xf32>
    %cst_7 = arith.constant 6.400000e+01 : f32
    %10 = vector.broadcast %cst_7 : f32 to vector<1x1xf32>
    %11 = arith.divf %9, %10 : vector<1x1xf32>
    %12 = vector.broadcast %11 : vector<1x1xf32> to vector<1x64xf32>
    %13 = arith.subf %6, %12 : vector<1x64xf32>
    %cst_8 = arith.constant dense<0.000000e+00> : vector<1xf32>
    %14 = vector.multi_reduction <add>, %7, %cst_8 [1] : vector<1x64xf32> to vector<1xf32>
    %15 = vector.shape_cast %14 : vector<1xf32> to vector<1x1xf32>
    %cst_9 = arith.constant 6.400000e+01 : f32
    %16 = vector.broadcast %cst_9 : f32 to vector<1x1xf32>
    %17 = arith.divf %15, %16 : vector<1x1xf32>
    %18 = vector.broadcast %17 : vector<1x1xf32> to vector<1x64xf32>
    %19 = arith.subf %7, %18 : vector<1x64xf32>
    %20 = math.absf %13 : vector<1x64xf32>
    %cst_10 = arith.constant dense<0xFF800000> : vector<1xf32>
    %21 = vector.multi_reduction <maximumf>, %20, %cst_10 [1] : vector<1x64xf32> to vector<1xf32>
    %22 = vector.shape_cast %21 : vector<1xf32> to vector<1x1xf32>
    %23 = math.absf %19 : vector<1x64xf32>
    %cst_11 = arith.constant dense<0xFF800000> : vector<1xf32>
    %24 = vector.multi_reduction <maximumf>, %23, %cst_11 [1] : vector<1x64xf32> to vector<1xf32>
    %25 = vector.shape_cast %24 : vector<1xf32> to vector<1x1xf32>
    %26 = arith.maximumf %22, %25 : vector<1x1xf32>
    %cst_12 = arith.constant 9.99999996E-13 : f32
    %27 = vector.broadcast %cst_12 : f32 to vector<1x1xf32>
    %28 = arith.maximumf %26, %27 : vector<1x1xf32>
    %cst_13 = arith.constant 1.000000e+00 : f32
    %29 = vector.broadcast %cst_13 : f32 to vector<1x1xf32>
    %30 = arith.divf %29, %28 : vector<1x1xf32>
    %31 = vector.broadcast %30 : vector<1x1xf32> to vector<1x64xf32>
    %32 = arith.mulf %13, %31 : vector<1x64xf32>
    %cst_14 = arith.constant -1.000000e+00 : f32
    %cst_15 = arith.constant 1.000000e+00 : f32
    %33 = vector.broadcast %cst_14 : f32 to vector<1x64xf32>
    %34 = arith.maximumf %33, %32 : vector<1x64xf32>
    %35 = vector.broadcast %cst_15 : f32 to vector<1x64xf32>
    %36 = arith.minimumf %35, %34 : vector<1x64xf32>
    %37 = vector.broadcast %30 : vector<1x1xf32> to vector<1x64xf32>
    %38 = arith.mulf %19, %37 : vector<1x64xf32>
    %cst_16 = arith.constant -1.000000e+00 : f32
    %cst_17 = arith.constant 1.000000e+00 : f32
    %39 = vector.broadcast %cst_16 : f32 to vector<1x64xf32>
    %40 = arith.maximumf %39, %38 : vector<1x64xf32>
    %41 = vector.broadcast %cst_17 : f32 to vector<1x64xf32>
    %42 = arith.minimumf %41, %40 : vector<1x64xf32>
    %43 = tpu.concatenate %36, %42 in 0 : vector<1x64xf32>, vector<1x64xf32> -> vector<2x64xf32>
    %c0_18 = arith.constant 0 : index
    %c0_19 = arith.constant 0 : index
    %44 = vector.load %arg4[%c0_18, %c0_19] : memref<64x256xf32, #tpu.memory_space<vmem>>, vector<64x256xf32>
    %cst_20 = arith.constant dense<0.000000e+00> : vector<2x256xf32>
    %45 = tpu.matmul %43, %44, %cst_20 {dimension_numbers = #tpu.dot_dimension_numbers<[1], [0], [0], [1], [0, 0, 1, 1], [], []>} : vector<2x64xf32>, vector<64x256xf32>, vector<2x256xf32> -> vector<2x256xf32>
    %46 = vector.extract_strided_slice %45 {offsets = [0, 0], sizes = [1, 256], strides = [1, 1]} : vector<2x256xf32> to vector<1x256xf32>
    %cst_21 = arith.constant 1.000000e+00 : f32
    %47 = vector.broadcast %cst_21 : f32 to vector<1x256xf32>
    %48 = arith.addf %46, %47 : vector<1x256xf32>
    %cst_22 = arith.constant 1.600000e+01 : f32
    %49 = vector.broadcast %cst_22 : f32 to vector<1x256xf32>
    %50 = arith.mulf %48, %49 : vector<1x256xf32>
    %cst_23 = arith.constant 1.000000e+00 : f32
    %51 = vector.broadcast %cst_23 : f32 to vector<1x256xf32>
    %52 = arith.subf %50, %51 : vector<1x256xf32>
    %cst_24 = arith.constant 5.000000e-01 : f32
    %53 = vector.broadcast %cst_24 : f32 to vector<1x256xf32>
    %54 = arith.mulf %52, %53 : vector<1x256xf32>
    %55 = vector.extract_strided_slice %45 {offsets = [1, 0], sizes = [1, 256], strides = [1, 1]} : vector<2x256xf32> to vector<1x256xf32>
    %cst_25 = arith.constant 1.000000e+00 : f32
    %56 = vector.broadcast %cst_25 : f32 to vector<1x256xf32>
    %57 = arith.addf %55, %56 : vector<1x256xf32>
    %cst_26 = arith.constant 1.600000e+01 : f32
    %58 = vector.broadcast %cst_26 : f32 to vector<1x256xf32>
    %59 = arith.mulf %57, %58 : vector<1x256xf32>
    %cst_27 = arith.constant 1.000000e+00 : f32
    %60 = vector.broadcast %cst_27 : f32 to vector<1x256xf32>
    %61 = arith.subf %59, %60 : vector<1x256xf32>
    %cst_28 = arith.constant 5.000000e-01 : f32
    %62 = vector.broadcast %cst_28 : f32 to vector<1x256xf32>
    %63 = arith.mulf %61, %62 : vector<1x256xf32>
    %64 = math.floor %54 : vector<1x256xf32>
    %65 = math.floor %63 : vector<1x256xf32>
    %66 = arith.subf %54, %64 : vector<1x256xf32>
    %cst_29 = arith.constant 1.000000e+00 : f32
    %67 = vector.broadcast %cst_29 : f32 to vector<1x256xf32>
    %68 = arith.subf %67, %66 : vector<1x256xf32>
    %69 = arith.subf %63, %65 : vector<1x256xf32>
    %cst_30 = arith.constant 1.000000e+00 : f32
    %70 = vector.broadcast %cst_30 : f32 to vector<1x256xf32>
    %71 = arith.subf %70, %69 : vector<1x256xf32>
    %72 = arith.fptosi %64 : vector<1x256xf32> to vector<1x256xi32>
    %c1_i32 = arith.constant 1 : i32
    %73 = vector.broadcast %c1_i32 : i32 to vector<1x256xi32>
    %74 = arith.addi %72, %73 : vector<1x256xi32>
    %75 = arith.fptosi %65 : vector<1x256xf32> to vector<1x256xi32>
    %c1_i32_31 = arith.constant 1 : i32
    %76 = vector.broadcast %c1_i32_31 : i32 to vector<1x256xi32>
    %77 = arith.addi %75, %76 : vector<1x256xi32>
    %78 = tpu.iota {dimensions = array<i32: 0>} : vector<256x256xi32>
    %c4_i32 = arith.constant 4 : i32
    %79 = vector.broadcast %c4_i32 : i32 to vector<256x256xi32>
    %80 = arith.shrsi %78, %79 : vector<256x256xi32>
    %c15_i32 = arith.constant 15 : i32
    %81 = vector.broadcast %c15_i32 : i32 to vector<256x256xi32>
    %82 = arith.andi %78, %81 : vector<256x256xi32>
    %83 = vector.broadcast %72 : vector<1x256xi32> to vector<256x256xi32>
    %84 = arith.cmpi eq, %82, %83 : vector<256x256xi32>
    %cst_32 = arith.constant 0.000000e+00 : f32
    %85 = vector.shape_cast %68 : vector<1x256xf32> to vector<1x256xf32>
    %86 = vector.broadcast %85 : vector<1x256xf32> to vector<256x256xf32>
    %87 = vector.broadcast %cst_32 : f32 to vector<256x256xf32>
    %88 = arith.select %84, %86, %87 : vector<256x256xi1>, vector<256x256xf32>
    %89 = vector.broadcast %74 : vector<1x256xi32> to vector<256x256xi32>
    %90 = arith.cmpi eq, %82, %89 : vector<256x256xi32>
    %cst_33 = arith.constant 0.000000e+00 : f32
    %91 = vector.shape_cast %66 : vector<1x256xf32> to vector<1x256xf32>
    %92 = vector.broadcast %91 : vector<1x256xf32> to vector<256x256xf32>
    %93 = vector.broadcast %cst_33 : f32 to vector<256x256xf32>
    %94 = arith.select %90, %92, %93 : vector<256x256xi1>, vector<256x256xf32>
    %95 = arith.addf %88, %94 : vector<256x256xf32>
    %96 = vector.broadcast %75 : vector<1x256xi32> to vector<256x256xi32>
    %97 = arith.cmpi eq, %80, %96 : vector<256x256xi32>
    %cst_34 = arith.constant 0.000000e+00 : f32
    %98 = vector.shape_cast %71 : vector<1x256xf32> to vector<1x256xf32>
    %99 = vector.broadcast %98 : vector<1x256xf32> to vector<256x256xf32>
    %100 = vector.broadcast %cst_34 : f32 to vector<256x256xf32>
    %101 = arith.select %97, %99, %100 : vector<256x256xi1>, vector<256x256xf32>
    %102 = vector.broadcast %77 : vector<1x256xi32> to vector<256x256xi32>
    %103 = arith.cmpi eq, %80, %102 : vector<256x256xi32>
    %cst_35 = arith.constant 0.000000e+00 : f32
    %104 = vector.shape_cast %69 : vector<1x256xf32> to vector<1x256xf32>
    %105 = vector.broadcast %104 : vector<1x256xf32> to vector<256x256xf32>
    %106 = vector.broadcast %cst_35 : f32 to vector<256x256xf32>
    %107 = arith.select %103, %105, %106 : vector<256x256xi1>, vector<256x256xf32>
    %108 = arith.addf %101, %107 : vector<256x256xf32>
    %109 = arith.mulf %95, %108 : vector<256x256xf32>
    %c0_36 = arith.constant 0 : index
    %c0_37 = arith.constant 0 : index
    %c0_38 = arith.constant 0 : index
    %110 = vector.load %arg5[%c0_36, %c0_37, %c0_38] : memref<1x4x256xf32, #tpu.memory_space<vmem>>, vector<1x4x256xf32>
    %111 = vector.shape_cast %110 : vector<1x4x256xf32> to vector<4x256xf32>
    %cst_39 = arith.constant dense<0.000000e+00> : vector<4x256xf32>
    %112 = tpu.matmul %111, %109, %cst_39 {dimension_numbers = #tpu.dot_dimension_numbers<[1], [0], [0], [1], [0, 0, 1, 1], [], []>} : vector<4x256xf32>, vector<256x256xf32>, vector<4x256xf32> -> vector<4x256xf32>
    %c0_40 = arith.constant 0 : index
    %c0_41 = arith.constant 0 : index
    %c0_42 = arith.constant 0 : index
    %113 = vector.load %arg6[%c0_40, %c0_41, %c0_42] : memref<1x4x256xf32, #tpu.memory_space<vmem>>, vector<1x4x256xf32>
    %114 = vector.shape_cast %113 : vector<1x4x256xf32> to vector<4x256xf32>
    %115 = vector.shape_cast %112 : vector<4x256xf32> to vector<1x4x256xf32>
    tpu.vector_store %arg6[%c0_40, %c0_41, %c0_42], %115 {strides = array<i32>} : memref<1x4x256xf32, #tpu.memory_space<vmem>>, vector<1x4x256xf32>,
    return
  }
  func.func @transform_0(%arg0: i32) -> (i32, i32, i32) {
    %c0_i32 = arith.constant 0 : i32
    %c0_i32_0 = arith.constant 0 : i32
    %c0_i32_1 = arith.constant 0 : i32
    return %arg0, %c0_i32, %c0_i32_0 : i32, i32, i32
  }
  func.func @transform_1(%arg0: i32) -> (i32, i32) {
    %c0_i32 = arith.constant 0 : i32
    %c0_i32_0 = arith.constant 0 : i32
    %c0_i32_1 = arith.constant 0 : i32
    return %c0_i32, %c0_i32_0 : i32, i32
  }
  func.func @transform_2(%arg0: i32) -> (i32, i32) {
    %c0_i32 = arith.constant 0 : i32
    %c0_i32_0 = arith.constant 0 : i32
    %c0_i32_1 = arith.constant 0 : i32
    return %c0_i32, %c0_i32_0 : i32, i32
  }
  func.func @transform_3(%arg0: i32) -> (i32, i32) {
    %c0_i32 = arith.constant 0 : i32
    %c0_i32_0 = arith.constant 0 : i32
    %c0_i32_1 = arith.constant 0 : i32
    return %c0_i32, %c0_i32_0 : i32, i32
  }
  func.func @transform_4(%arg0: i32) -> (i32, i32, i32) {
    %c0_i32 = arith.constant 0 : i32
    %c0_i32_0 = arith.constant 0 : i32
    %c0_i32_1 = arith.constant 0 : i32
    return %arg0, %c0_i32, %c0_i32_0 : i32, i32, i32
  }
  func.func @transform_5(%arg0: i32) -> (i32, i32, i32) {
    %c0_i32 = arith.constant 0 : i32
    %c0_i32_0 = arith.constant 0 : i32
    %c0_i32_1 = arith.constant 0 : i32
    return %arg0, %c0_i32, %c0_i32_0 : i32, i32, i32
  }
}

</mosaic_0001>

<bundles_post_ra>
// kernel: tpu_custom_call.1
= control target key start
LH: loop header
LB: loop body
LE: loop exit
PB: predicated region body
PF: predicated region fallthrough
CT: control target
= control target key end

     0   :  { %10 = vsyncpa [#allocation3], 0  ;;  %s3317_s0 = inlined_call_operand.hbm [shape: f32[2,1,128], index: 0, kind: input, shape index: {}]   ;;  %s3318_s1 = inlined_call_operand.hbm [shape: f32[128,128], index: 1, kind: input, shape index: {}]   ;;  %s3319_s2 = inlined_call_operand.vmem [shape: f32[1,128], index: 2, kind: input, shape index: {}]   ;;  %s3320_s3 = inlined_call_operand.hbm [shape: f32[64,256], index: 3, kind: input, shape index: {}]   ;;  %s3321_s4 = inlined_call_operand.hbm [shape: f32[2,4,256], index: 4, kind: input, shape index: {}]   ;;  %s3322_s5 = inlined_call_operand.hbm [shape: f32[2,4,256], index: 5, kind: output, shape index: {}]  }
   0x1   :  { %12 = vsyncpa [#allocation3 + $0x1], 0 }
   0x2   :  { %13 = vsyncpa [#allocation6], 0 }
   0x3   :  { %14 = vsyncpa [#allocation9], 0 }
   0x4   :  { %16 = vsyncpa [#allocation9 + $0x1], 0 }
   0x5   :  { %17 = vsyncpa [#allocation4], 0 }
   0x6   :  { %19 = vsyncpa [#allocation4 + $0x1], 0  ;;  %s2124_s18 = smov 0   ;;  %s2126_s19 = smov 0  }
   0x7   :  { %s2128_s20 = smov 0   ;;  %s2130_s21 = smov 0  }
   0x8 LB: > { %s2145_s22 = sadd.s32 4294967295, %s2079_s21   ;;  %s1620_s23 = sadd.s32 4294967294, %s2079_s21   ;;  %s2079_s21 = sphi %s2130_s21, %s3390_s21   ;;  %s2075_s20 = sphi %s2128_s20, %s3389_s20   ;;  %s2071_s19 = sphi %s2126_s19, %s3388_s19   ;;  %s2067_s18 = sphi %s2124_s18, %s3387_s18  }
   0x9   : > { %p45_p0 = scmp.ne.s32.totalorder %s2071_s19, %s2067_s18  ;;  %p3323_p1 = scmp.eq.s32.totalorder %s2145_s22, 0 }
   0xa   : > { %p164_p3 = scmp.eq.s32.totalorder %s1620_s23, 1  ;;  %p1621_p5 = scmp.ge.s32.totalorder %s2079_s21, 1 }
   0xb   : > { %p2154_p4 = por %p3323_p1, %p45_p0  ;;  %p171_p7 = scmp.lt.s32.totalorder %s2079_s21, 3 }
   0xc   : > { %p2159_p6 = por %p164_p3, %p45_p0  ;;  %s2081_s27 = smov [#allocation5]  }
   0xd   : > { %s3343_s24 = scalar_select %p2154_p4, 1, 0 }
   0xe   : > { %s3344_s25 = scalar_select %p2159_p6, 1, 0 }
   0xf   : > { %p2164_p8 = pnand %p1621_p5, %p171_p7  ;;  %s183_s28 = sshll.u32 %s2081_s27, 4  ;;  %s2168_s28 = int_to_ptr.vmem [resolvable:$true] %s183_s28 }
  0x10   : > { %s2082_s30 = smov [#allocation7]   ;;  %s1889_s9 = scalar_lea.hbm %s3318_s1, 2048 }
  0x11   : > { %s3345_s26 = scalar_select %p2164_p8, 1, 0 }
  0x12   : > { %p1820_p9 = pneg %p2164_p8  ;;  %s199_s6 = sshll.u32 %s2082_s30, 4  ;;  %s2179_s6 = int_to_ptr.vmem [resolvable:$true] %s199_s6 }
  0x13   : > { %p1890_p12 = scmp.ne.s32.totalorder %s3318_s1, %s1889_s9  ;;  %p1896_p5 = scmp.lt.u32.totalorder %s1889_s9, %s3318_s1 }
  0x14   : > { %p2175_p11 = pnand %p1820_p9, %p3323_p1 }
  0x16   : > { %p1891_p13 = pneg %p2175_p11 }
  0x18   : > { %p1892_p0 = pnand %p1891_p13, %p1890_p12 }
  0x1a   : > { %p1893_p3 = pneg %p1892_p0 }
  0x1c   : > { %p1898_p7 = pnand %p1896_p5, %p1893_p3 }
  0x1e   : > { %1901 = shalt.err (!%p1898_p7)
}
  0x1f   : > { %s1902_s14 = scalar_lea.vmem %s2168_s28, 2048  ;;  %p1910_p2 = scmp.lt.s32.totalorder %s2168_s28, %s2168_s28 }
  0x20   : > { %p1903_p9 = scmp.ne.s32.totalorder %s2168_s28, %s1902_s14  ;;  %p1911_p12 = scmp.lt.s32.totalorder %s1902_s14, %s1902_s14 }
  0x22   : > { %p1905_p10 = pnand %p1903_p9, %p1891_p13  ;;  %p1912_p0 = por %p1911_p12, %p1910_p2 }
  0x24   : > { %p1906_p1 = pneg %p1905_p10 }
  0x26   : > { %p1913_p6 = pnand %p1912_p0, %p1906_p1 }
  0x28   : > { %1916 = shalt.err (!%p1913_p6)
}
  0x29   : > { %s2083_s15 = smov 128   ;;  %s2084_s16 = smov 8  }
  0x2a   : > { %1823 = dma.hbm_to_vmem [thread:$0]  (!%p2175_p11), %s3318_s1, 2048, %s2168_s28, [#allocation6], %s2083_s15, %s2083_s15, %s2084_s16  }
  0x2b   : > { %s1917_s7 = scalar_lea.hbm %s3320_s3, 2048 }
  0x2c   : > { %p1918_p2 = scmp.ne.s32.totalorder %s3320_s3, %s1917_s7  ;;  %p1924_p10 = scmp.lt.u32.totalorder %s1917_s7, %s3320_s3 }
  0x2e   : > { %p1920_p1 = pnand %p1918_p2, %p1891_p13 }
  0x30   : > { %p1921_p6 = pneg %p1920_p1 }
  0x32   : > { %p1926_p3 = pnand %p1924_p10, %p1921_p6 }
  0x34   : > { %1929 = shalt.err (!%p1926_p3)
}
  0x35   : > { %s1930_s28 = scalar_lea.vmem %s2179_s6, 2048  ;;  %p1938_p12 = scmp.lt.s32.totalorder %s2179_s6, %s2179_s6 }
  0x36   : > { %p1931_p5 = scmp.ne.s32.totalorder %s2179_s6, %s1930_s28  ;;  %p1939_p0 = scmp.lt.s32.totalorder %s1930_s28, %s1930_s28 }
  0x38   : > { %p1933_p7 = pnand %p1931_p5, %p1891_p13  ;;  %p1940_p2 = por %p1939_p0, %p1938_p12 }
  0x3a   : > { %p1934_p9 = pneg %p1933_p7 }
  0x3c   : > { %p1941_p1 = pnand %p1940_p2, %p1934_p9 }
  0x3e   : > { %1944 = shalt.err (!%p1941_p1)
}
  0x3f   : > { %s2085_s12 = smov 256   ;;  %s2086_s13 = smov 16  }
  0x40   : > { %1826 = dma.hbm_to_vmem [thread:$0]  (!%p2175_p11), %s3320_s3, 2048, %s2179_s6, [#allocation6], %s2085_s12, %s2085_s12, %s2086_s13  }
  0x41   : > { %s2234_s16 = sadd.s32 1, %s2079_s21   ;;  %s32_s23 = sadd.s32 1, %s2075_s20 }
  0x42   : > { %s29_s17 = ssub.s32 %s2079_s21, %s2234_s16  ;;  %p39_p6 = scmp.ne.s32.totalorder %s2075_s20, %s2071_s19 }
  0x43   : > { %p30_p13 = scmp.eq.s32.totalorder %s29_s17, 0  ;;  %p40_p10 = scmp.eq.s32.totalorder %s2079_s21, 0 }
  0x44   : > { %p3347_p5 = scmp.eq.s32.totalorder %s2145_s22, 1  ;;  %p1840_p9 = scmp.lt.s32.totalorder %s2079_s21, 2 }
  0x45   : > { %s2243_s27 = scalar_select %p30_p13, %s2075_s20, %s32_s23  }
  0x46   : > { %p41_p3 = por %p40_p10, %p39_p6  ;;  %p2247_p7 = por %p3347_p5, %p39_p6 }
  0x47   : > { %s2253_s29 = sand.u32 1, %s2075_s20   ;;  %s1625_s6 = sshll.u32 %s2079_s21, 4 }
  0x48   : > { %s3348_s30 = scalar_select %p2247_p7, 1, 0 }
  0x49   : > { %s216_s7 = scalar_lea.vmem [#allocation2], %s2253_s29  ;;  %s2260_s11 = scalar_lea.hbm %s3317_s0, %s1625_s6 }
  0x4a   : > { %s223_s8 = sshll.u32 %s216_s7, 4  ;;  %p2264_p11 = pnand %p1840_p9, %p41_p3  ;;  %s2262_s8 = int_to_ptr.vmem [resolvable:$true] %s223_s8 }
  0x4b   : > { %s1626_s12 = sshll.u32 %s2253_s29, 3  ;;  %s1644_s13 = sshll.u32 %s2079_s21, 7 }
  0x4c   : > { %s214_s14 = scalar_lea.sflag [#allocation3], %s2253_s29  ;;  %s1945_s15 = scalar_lea.hbm %s2260_s11, 16 }
  0x4d   : > { %p1946_p12 = scmp.ne.s32.totalorder %s2260_s11, %s1945_s15  ;;  %p1947_p0 = pneg %p2264_p11 }
  0x4e   : > { %s1950_s6 = scalar_lea.hbm %s3317_s0, 32  ;;  %p1951_p13 = scmp.lt.u32.totalorder %s2260_s11, %s3317_s0 }
  0x4f   : > { %p1948_p2 = pnand %p1947_p0, %p1946_p12  ;;  %p1952_p6 = scmp.lt.u32.totalorder %s1950_s6, %s1945_s15 }
  0x50   : > { %p1954_p3 = scmp.lt.u32.totalorder %s1945_s15, %s2260_s11 }
  0x51   : > { %p1949_p1 = pneg %p1948_p2  ;;  %p1953_p10 = por %p1952_p6, %p1951_p13 }
  0x53   : > { %p1955_p5 = por %p1954_p3, %p1953_p10 }
  0x55   : > { %p1956_p9 = pnand %p1955_p5, %p1949_p1 }
  0x57   : > { %1959 = shalt.err (!%p1956_p9)
}
  0x58   : > { %s1960_s10 = scalar_lea.vmem %s2262_s8, 16  ;;  %s2087_s17 = smov [#allocation2]  }
  0x59   : > { %p1961_p12 = scmp.ne.s32.totalorder %s2262_s8, %s1960_s10  ;;  %s1965_s23 = sshll.u32 %s2087_s17, 4  ;;  %s1966_s23 = int_to_ptr.vmem [resolvable:$false] %s1965_s23 }
  0x5a   : > { %s1967_s7 = scalar_lea.vmem %s1966_s23, 32  ;;  %p1968_p4 = scmp.lt.s32.totalorder %s2262_s8, %s1966_s23 }
  0x5b   : > { %p1963_p2 = pnand %p1961_p12, %p1947_p0  ;;  %p1969_p13 = scmp.lt.s32.totalorder %s1967_s7, %s1960_s10 }
  0x5d   : > { %p1964_p7 = pneg %p1963_p2  ;;  %p1970_p6 = por %p1969_p13, %p1968_p4 }
  0x5f   : > { %p1971_p10 = pnand %p1970_p6, %p1964_p7 }
  0x61   : > { %1974 = shalt.err (!%p1971_p10)
}
  0x62   : > { %1830 = dma.hbm_to_vmem [thread:$0]  (!%p2264_p11), %s2260_s11, 16, %s2262_s8, %s214_s14  }
  0x63   : > { %s2301_s9 = scalar_lea.hbm %s3321_s4, %s1644_s13  ;;  %s234_s10 = scalar_lea.vmem [#allocation8], %s1626_s12 }
  0x64   : > { %s242_s17 = sshll.u32 %s234_s10, 4  ;;  %s231_s23 = scalar_lea.sflag [#allocation9], %s2253_s29  ;;  %s243_s17 = int_to_ptr.vmem [resolvable:$true] %s242_s17 }
  0x65   : > { %s1975_s7 = scalar_lea.hbm %s2301_s9, 128  ;;  %s1980_s13 = scalar_lea.hbm %s3321_s4, 256 }
  0x66   : > { %p1976_p4 = scmp.ne.s32.totalorder %s2301_s9, %s1975_s7  ;;  %p1981_p3 = scmp.lt.u32.totalorder %s2301_s9, %s3321_s4 }
  0x67   : > { %p1982_p5 = scmp.lt.u32.totalorder %s1980_s13, %s1975_s7  ;;  %p1984_p12 = scmp.lt.u32.totalorder %s1975_s7, %s2301_s9 }
  0x68   : > { %p1978_p7 = pnand %p1976_p4, %p1947_p0 }
  0x69   : > { %p1983_p9 = por %p1982_p5, %p1981_p3 }
  0x6a   : > { %p1979_p1 = pneg %p1978_p7 }
  0x6b   : > { %p1985_p2 = por %p1984_p12, %p1983_p9 }
  0x6d   : > { %p1986_p13 = pnand %p1985_p2, %p1979_p1 }
  0x6f   : > { %1989 = shalt.err (!%p1986_p13)
}
  0x70   : > { %s1990_s29 = scalar_lea.vmem %s243_s17, 128  ;;  %s2088_s12 = smov [#allocation8]  }
  0x71   : > { %p1991_p6 = scmp.ne.s32.totalorder %s243_s17, %s1990_s29  ;;  %s1995_s6 = sshll.u32 %s2088_s12, 4  ;;  %s1996_s6 = int_to_ptr.vmem [resolvable:$false] %s1995_s6 }
  0x72   : > { %s1997_s10 = scalar_lea.vmem %s1996_s6, 256  ;;  %p1998_p7 = scmp.lt.s32.totalorder %s243_s17, %s1996_s6 }
  0x73   : > { %p1993_p10 = pnand %p1991_p6, %p1947_p0  ;;  %p1999_p8 = scmp.lt.s32.totalorder %s1997_s10, %s1990_s29 }
  0x75   : > { %p1994_p4 = pneg %p1993_p10  ;;  %p2000_p3 = por %p1999_p8, %p1998_p7 }
  0x77   : > { %p2001_p5 = pnand %p2000_p3, %p1994_p4 }
  0x79   : > { %2004 = shalt.err (!%p2001_p5)
}
  0x7a   : > { %1833 = dma.hbm_to_vmem [thread:$0]  (!%p2264_p11), %s2301_s9, 128, %s243_s17, %s231_s23  }
  0x7b   : > { %p3350_p1 = scmp.ne.s32.totalorder %s3345_s26, 0 }
  0x7d   : > { %251 = sbr.rel (%p3350_p1) target bundleno = 1592 (0x638), region = 40 }
  0x84   : > { %s2328_s7 = sand.u32 1, %s2071_s19   ;;  %p3351_p0 = scmp.ne.s32.totalorder %s3343_s24, 0 }
  0x85   : > { %s254_s8 = scalar_lea.sflag [#allocation3], %s2328_s7  ;;  %s256_s11 = scalar_lea.vmem [#allocation2], %s2328_s7 }
  0x86   : > { %2050 = dma.done.wait (%p3351_p0), %s254_s8, 16  }
  0x87   : > { %2052 = vsyncadd (%p3351_p0), %s254_s8, 4294967280  ;;  %p3352_p8 = scmp.eq.s32.totalorder %s2145_s22, 0 }
  0x89   : > { %2054 = dma.done.wait (%p3352_p8), [#allocation6], 4096   ;;  %p3353_p11 = pmov %p3352_p8 }
  0x8a   : > { %s1632_s26 = sshll.u32 %s2328_s7, 3  ;;  %s270_s28 = scalar_lea.sflag [#allocation9], %s2328_s7 }
  0x8b   : > { %2056 = vsyncadd (%p3353_p11), [#allocation6], 4294963200  ;;  %s2344_s9 = scalar_lea.vmem [#allocation8], %s1632_s26 }
  0x8c   : > { %2058 = dma.done.wait (%p3351_p0), %s270_s28, 128  }
  0x8d   : > { %2060 = vsyncadd (%p3351_p0), %s270_s28, 4294967168  ;;  %v2089_v0 = vmov 0.0|0.0   ;;  %vm2090_vm0 = vmmov 0   ;;  %v2091_v1 = vmov 0.0   ;;  %v306_v2 = vld [vmem:[#allocation5] sm:$0xff]  ;;  %v307_v3 = vld [vmem:[#allocation5 + $0x8] sm:$0xff]  ;;  %v401_v27 = vlaneseq }
  0x8e   : > { %1698 = vmatprep.subr.bf16.mxu0 %v2089_v0  ;;  %1695 = vmatprep.mubr.msk.f32.mxu0 %vm2090_vm0, %v2091_v1  ;;  %v308_v4 = vld [vmem:[#allocation5 + $0x10] sm:$0xff]  ;;  %v1699_v5 = vpack.c.bf16 %v307_v3, %v306_v2  ;;  %v309_v6 = vld [vmem:[#allocation5 + $0x18] sm:$0xff]  ;;  %v310_v8 = vld [vmem:[#allocation5 + $0x20] sm:$0xff]  ;;  %s2092_s23 = smov 64   ;;  %vm393_vm1 = vcmask 516096   ;;  %vm418_vm2 = vcmask 1040896  }
  0x8f   : > { %v1702_v7 = vpack.c.bf16 %v309_v6, %v308_v4  ;;  %v311_v9 = vld [vmem:[#allocation5 + $0x28] sm:$0xff]  ;;  %v312_v11 = vld [vmem:[#allocation5 + $0x30] sm:$0xff]  ;;  %v313_v12 = vld [vmem:[#allocation5 + $0x38] sm:$0xff]  ;;  %v2352_v28 = vshrl.u32 %v401_v27, 7  ;;  %vm440_vm3 = vcmask 1040384   ;;  %vm458_vm4 = vcmask 523264  }
  0x90   : > { %1700 = vmatpush3.bf16.msra.mxu0 %v1699_v5  ;;  %v1705_v10 = vpack.c.bf16 %v311_v9, %v310_v8  ;;  %v1708_v13 = vpack.c.bf16 %v313_v12, %v312_v11  ;;  %v314_v14 = vld [vmem:[#allocation5 + $0x40] sm:$0xff]  ;;  %v315_v15 = vld [vmem:[#allocation5 + $0x48] sm:$0xff]  ;;  %v316_v17 = vld [vmem:[#allocation5 + $0x50] sm:$0xff]  ;;  %s1645_s13 = sshll.u32 %s2145_s22, 7  ;;  %s303_s14 = scalar_lea.vmem [#allocation10], %s1632_s26 }
  0x91   : > { %1701 = vmatprep.subr.bf16.mxu0 %v2089_v0  ;;  %v1711_v16 = vpack.c.bf16 %v315_v15, %v314_v14  ;;  %v317_v18 = vld [vmem:[#allocation5 + $0x58] sm:$0xff]  ;;  %v318_v20 = vld [vmem:[#allocation5 + $0x60] sm:$0xff]  ;;  %v319_v21 = vld [vmem:[#allocation5 + $0x68] sm:$0xff]  ;;  %3354 = vst [vmem:[#allocation15_spill] sm:$0xff] %v2352_v28  ;;  %v2358_v30 = vsub.s32 0, %v2352_v28  ;;  %s1511_s15 = sshll.u32 %s303_s14, 4  ;;  %s3273_s6 = scalar_lea.hbm %s3322_s5, %s1645_s13  ;;  %s3275_s15 = int_to_ptr.vmem [resolvable:$true] %s1511_s15 }
  0x92   : > { %v1714_v19 = vpack.c.bf16 %v317_v18, %v316_v17  ;;  %v1717_v22 = vpack.c.bf16 %v319_v21, %v318_v20  ;;  %v320_v23 = vld [vmem:[#allocation5 + $0x70] sm:$0xff]  ;;  %v321_v24 = vld [vmem:[#allocation5 + $0x78] sm:$0xff]  ;;  %v443_v48 = vld [vmem:[#allocation7 + $0x8] sm:$0xff]  ;;  %v553_v20 = vadd.s32 8, %v2352_v28  ;;  %v554_v21 = vadd.s32 16, %v2352_v28  ;;  %s1497_s10 = scalar_lea.sflag [#allocation4], %s2328_s7 }
  0x93   : > { %v1720_v25 = vpack.c.bf16 %v321_v24, %v320_v23  ;;  %v305_v26 = vld [vmem:[%s256_s11] sm:$0x1]  ;;  %v442_v50 = vld [vmem:[#allocation7] sm:$0xff]  ;;  %v444_v52 = vld [vmem:[#allocation7 + $0x10] sm:$0xff]  ;;  %v2368_v23 = vsub.s32 1, %v2352_v28  ;;  %v556_v24 = vadd.s32 32, %v2352_v28 }
  0x94   : > { %1703 = vmatpush3.bf16.msra.mxu0 %v1702_v7  ;;  %v304_v29 = vld [vmem:[%s3319_s2] sm:$0x1]  ;;  %v447_v53 = vld [vmem:[#allocation7 + $0x28] sm:$0xff]  ;;  %v1724_v55 = vpack.c.bf16 %v444_v52, %v442_v50  ;;  %v446_v57 = vld [vmem:[#allocation7 + $0x20] sm:$0xff]  ;;  %v2375_v27 = vshra.s32 %v553_v20, 4  ;;  %s2005_s8 = scalar_lea.vmem %s3275_s15, 128 }
  0x95   : > { %1704 = vmatprep.subr.bf16.mxu0 %v2089_v0  ;;  %v445_v49 = vld [vmem:[#allocation7 + $0x18] sm:$0xff]  ;;  %v448_v58 = vld [vmem:[#allocation7 + $0x30] sm:$0xff]  ;;  %v451_v59 = vld [vmem:[#allocation7 + $0x48] sm:$0xff]  ;;  %p2006_p9 = scmp.ne.s32.totalorder %s3275_s15, %s2005_s8  ;;  %p3384_p12 = scmp.ne.s32.totalorder %s3348_s30, 0 }
  0x96   : > { %v1722_v51 = vpack.c.bf16 %v445_v49, %v443_v48  ;;  %v449_v54 = vld [vmem:[#allocation7 + $0x38] sm:$0xff]  ;;  %v1728_v61 = vpack.c.bf16 %v448_v58, %v446_v57  ;;  %v450_v63 = vld [vmem:[#allocation7 + $0x40] sm:$0xff]  ;;  %v456_v6 = vld [vmem:[#allocation7 + $0x70] sm:$0xff]  ;;  %s2093_s22 = smov [#allocation10]  }
  0x97   : > { %v1726_v56 = vpack.c.bf16 %v449_v54, %v447_v53  ;;  %v453_v60 = vld [vmem:[#allocation7 + $0x58] sm:$0xff]  ;;  %v454_v5 = vld [vmem:[#allocation7 + $0x60] sm:$0xff]  ;;  %p2007_p2 = pnand %p2006_p9, %p3384_p12  ;;  %s2009_s11 = sshll.u32 %s2093_s22, 4  ;;  %s2010_s11 = int_to_ptr.vmem [resolvable:$false] %s2009_s11 }
  0x98   : > { %1706 = vmatpush3.bf16.msra.mxu0 %v1705_v10  ;;  %v1730_v62 = vpack.c.bf16 %v453_v60, %v451_v59  ;;  %v457_v2 = vld [vmem:[#allocation7 + $0x78] sm:$0xff]  ;;  %v1736_v7 = vpack.c.bf16 %v456_v6, %v454_v5  ;;  %v566_v59 = vadd.s32 112, %v2352_v28  ;;  %v567_v60 = vadd.s32 120, %v2352_v28  ;;  %s2011_s26 = scalar_lea.vmem %s2010_s11, 256  ;;  %p2012_p6 = scmp.lt.s32.totalorder %s3275_s15, %s2010_s11 }
  0x99   : > { %1707 = vmatprep.subr.bf16.mxu0 %v2089_v0  ;;  %v569_v5 = vadd.s32 136, %v2352_v28  ;;  %p2008_p13 = pneg %p2007_p2  ;;  %p2013_p10 = scmp.lt.s32.totalorder %s2011_s26, %s2005_s8 }
  0x9b   : > { %p2014_p4 = por %p2013_p10, %p2012_p6 }
  0x9c   : > { %1709 = vmatpush3.bf16.msra.mxu0 %v1708_v13 }
  0x9d   : > { %1710 = vmatprep.subr.bf16.mxu0 %v2089_v0  ;;  %p2015_p7 = pnand %p2014_p4, %p2008_p13 }
  0xa0   : > { %1712 = vmatpush3.bf16.msra.mxu0 %v1711_v16 }
  0xa1   : > { %1713 = vmatprep.subr.bf16.mxu0 %v2089_v0 }
  0xa4   : > { %1715 = vmatpush3.bf16.msra.mxu0 %v1714_v19 }
  0xa5   : > { %1716 = vmatprep.subr.bf16.mxu0 %v2089_v0 }
  0xa8   : > { %1718 = vmatpush3.bf16.msra.mxu0 %v1717_v22  ;;  %v555_v22 = vadd.s32 24, %v2352_v28 }
  0xa9   : > { %1719 = vmatprep.subr.bf16.mxu0 %v2089_v0  ;;  %v452_v0 = vld [vmem:[#allocation7 + $0x50] sm:$0xff] }
  0xaa   : > { %v1732_v3 = vpack.c.bf16 %v452_v0, %v450_v63 }
  0xac   : > { %1721 = vmatpush3.bf16.msra.mxu0 %v1720_v25  ;;  %v557_v25 = vadd.s32 40, %v2352_v28 }
  0xad   : > { %1723 = vmatprep.subr.bf16.mxu0 %v1722_v51  ;;  %v565_v51 = vadd.s32 104, %v2352_v28 }
  0xaf   : > { %1696 = vmatmul.mubr.f32.vlgmr.msra.gmra.mrb[0].mxu0 %v305_v26  ;;  %v2373_v26 = vshra.s32 %v2352_v28, 4 }
  0xb0   : > { %526 = vmatprep.mubr.f32.mxu0 %v2091_v1  ;;  %1725 = vmatpush1.bf16.msra.mxu0 %v1724_v55  ;;  %v455_v1 = vld [vmem:[#allocation7 + $0x68] sm:$0xff] }
  0xb1   : > { %1727 = vmatprep.subr.bf16.mxu0 %v1726_v56  ;;  %v1734_v4 = vpack.c.bf16 %v457_v2, %v455_v1 }
  0xb4   : > { %1729 = vmatpush1.bf16.msra.mxu0 %v1728_v61 }
  0xb5   : > { %1731 = vmatprep.subr.bf16.mxu0 %v1730_v62 }
  0xb8   : > { %1733 = vmatpush1.bf16.msra.mxu0 %v1732_v3  ;;  %v2434_v3 = vshra.s32 %v565_v51, 4 }
  0xb9   : > { %1735 = vmatprep.subr.bf16.mxu0 %v1734_v4  ;;  %v568_v4 = vadd.s32 128, %v2352_v28 }
  0xbc   : > { %1737 = vmatpush1.bf16.msra.mxu0 %v1736_v7 }
 0x182   : > { %v388_v31 = vpop.f32.mrb[0].mxu0 }
 0x183   : > { %v392_v32 = vadd.f32 %v388_v31, %v304_v29  ;;  %v1697_v33 = vpop.f32.mrb[1].mxu0  ;;  %v2378_v29 = vand.u32 15, %v2352_v28  ;;  %v558_v31 = vadd.s32 48, %v2352_v28 }
 0x184   : > { %v2383_v33 = vshra.s32 %v554_v21, 4 }
 0x185   : > { %v404_v34 = vrot.slane %v392_v32, %v2358_v30  ;;  %v394_v35 = vsel %vm393_vm1, %v392_v32, 0.0  ;;  %v2409_v49 = vand.u32 15, %v558_v31 }
 0x187   : > { %405 = vrot.lane.b32.xlu0 %v404_v34, %s2092_s23  ;;  %v2385_v34 = vshra.s32 %v555_v22, 4 }
 0x1a6   : > { %395 = vadd.xlane.f32.xlu0 %v394_v35  ;;  %v559_v35 = vadd.s32 56, %v2352_v28 }
 0x1a8   : > { %v2407_v48 = vshra.s32 %v559_v35, 4  ;;  %v2411_v50 = vand.u32 15, %v559_v35 }
 0x1f9   : > { %v406_v36 = vpop.permute.xlu0 %405 }
 0x1fa   : > { %v408_v37 = vsel %vm393_vm1, %v406_v36, 0.0  ;;  %v2388_v36 = vand.u32 15, %v554_v21  ;;  %v573_v21 = vadd.s32 168, %v2352_v28 }
 0x1fb   : > { %409 = vadd.xlane.f32.xlu1 %v408_v37  ;;  %v2390_v37 = vand.u32 15, %v555_v22 }
 0x233   : > { %v396_v38 = vpop.xlane.xlu0 %395 }
 0x234   : > { %v398_v39 = vmul.f32 0.015625, %v396_v38  ;;  %v560_v38 = vadd.s32 64, %v2352_v28 }
 0x236   : > { %v399_v40 = vsub.f32 %v392_v32, %v398_v39  ;;  %v561_v39 = vadd.s32 72, %v2352_v28  ;;  %v2414_v52 = vshra.s32 %v560_v38, 4  ;;  %v2418_v54 = vand.u32 15, %v560_v38 }
 0x238   : > { %v413_v41 = vand.u32 2147483647, %v399_v40  ;;  %v2416_v53 = vshra.s32 %v561_v39, 4  ;;  %v2420_v55 = vand.u32 15, %v561_v39 }
 0x23a   : > { %v414_v42 = vsel %vm393_vm1, %v413_v41, -inf  ;;  %v2396_v41 = vshra.s32 %v557_v25, 4 }
 0x23b   : > { %415 = vmax.xlane.f32.xlu1 %v414_v42  ;;  %v562_v42 = vadd.s32 80, %v2352_v28 }
 0x23d   : > { %v2422_v57 = vshra.s32 %v562_v42, 4  ;;  %v2428_v63 = vand.u32 15, %v562_v42 }
 0x288   : > { %v410_v43 = vpop.xlane.xlu1 %409 }
 0x289   : > { %v411_v44 = vmul.f32 0.015625, %v410_v43  ;;  %v563_v43 = vadd.s32 88, %v2352_v28 }
 0x28b   : > { %v412_v45 = vsub.f32 %v392_v32, %v411_v44  ;;  %v2381_v32 = vand.u32 15, %v553_v20  ;;  %v2400_v44 = vand.u32 15, %v556_v24  ;;  %v2424_v58 = vshra.s32 %v563_v43, 4 }
 0x28c   : > { %v2430_v0 = vand.u32 15, %v563_v43  ;;  %v2455_v20 = vshra.s32 %v569_v5, 4 }
 0x28d   : > { %v417_v46 = vand.u32 2147483647, %v412_v45 }
 0x28e   : > { %3356 = vst [vmem:[#allocation17_spill] sm:$0xff] %v2455_v20 }
 0x28f   : > { %v419_v47 = vsel %vm418_vm2, %v417_v46, -inf  ;;  %v2404_v46 = vshra.s32 %v558_v31, 4 }
 0x290   : > { %420 = vmax.xlane.f32.xlu1 %v419_v47  ;;  %v564_v47 = vadd.s32 96, %v2352_v28 }
 0x292   : > { %v2432_v1 = vshra.s32 %v564_v47, 4  ;;  %v2438_v7 = vand.u32 15, %v564_v47 }
 0x2c8   : > { %v416_v8 = vpop.xlane.xlu1 %415 }
 0x31d   : > { %v421_v9 = vpop.xlane.xlu1 %420 }
 0x31e   : > { %v422_v10 = vmax.f32 %v416_v8, %v421_v9  ;;  %v2440_v8 = vand.u32 15, %v565_v51  ;;  %v570_v9 = vadd.s32 144, %v2352_v28  ;;  %v574_v51 = vadd.s32 176, %v2352_v28 }
 0x320   : > { %v423_v11 = vmax.f32 %v422_v10, 1e-12  ;;  %v2462_v31 = vshra.s32 %v570_v9, 4  ;;  %v2466_v39 = vand.u32 15, %v570_v9 }
 0x322   : > { %1887 = vrcp.f32 %v423_v11  ;;  %v2443_v11 = vshra.s32 %v566_v59, 4  ;;  %3357 = vst [vmem:[#allocation18_spill] sm:$0xff] %v2462_v31  ;;  %3359 = vst [vmem:[#allocation20_spill] sm:$0xff] %v2466_v39 }
 0x32c   : > { %v1888_v12 = vpop.eup %1887 }
 0x32d   : > { %v429_v13 = vmul.f32 %v1888_v12, %v412_v45  ;;  %v426_v16 = vmul.f32 %v1888_v12, %v399_v40  ;;  %v2394_v40 = vshra.s32 %v556_v24, 4  ;;  %v2402_v45 = vand.u32 15, %v557_v25 }
 0x32e   : > { %v2445_v12 = vshra.s32 %v567_v60, 4  ;;  %v2458_v24 = vand.u32 15, %v568_v4  ;;  %v2460_v25 = vand.u32 15, %v569_v5  ;;  %v2480_v5 = vshra.s32 %v574_v51, 4 }
 0x32f   : > { %v1635_v14 = vclamps-f32 %v429_v13, 1.0  ;;  %v1634_v17 = vclamps-f32 %v426_v16, 1.0  ;;  %v571_v13 = vadd.s32 152, %v2352_v28  ;;  %v2450_v16 = vand.u32 15, %v567_v60 }
 0x330   : > { %v2474_v60 = vshra.s32 %v573_v21, 4  ;;  %3365 = vst [vmem:[#allocation26_spill] sm:$0xff] %v2480_v5 }
 0x331   : > { %v436_v15 = vrot.slane %v1635_v14, %v2358_v30  ;;  %v2464_v38 = vshra.s32 %v571_v13, 4  ;;  %v2468_v42 = vand.u32 15, %v571_v13  ;;  %v2484_v13 = vand.u32 15, %v574_v51 }
 0x332   : > { %3362 = vst [vmem:[#allocation23_spill] sm:$0xff] %v2474_v60 }
 0x333   : > { %437 = vrot.lane.b32.xlu1 %v436_v15, %s2092_s23  ;;  %v2448_v15 = vand.u32 15, %v566_v59  ;;  %3358 = vst [vmem:[#allocation19_spill] sm:$0xff] %v2464_v38  ;;  %3360 = vst [vmem:[#allocation21_spill] sm:$0xff] %v2468_v42 }
 0x334   : > { %3367 = vst [vmem:[#allocation28_spill] sm:$0xff] %v2484_v13 }
 0x3a5   : > { %v438_v18 = vpop.permute.xlu1 %437 }
 0x3a6   : > { %v441_v19 = vsel %vm440_vm3, %v1634_v17, %v438_v18  ;;  %v572_v17 = vadd.s32 160, %v2352_v28 }
 0x3a7   : > { %1636 = vmatmul.mubr.msk.f32.vlgmr.msra.gmra.mrb[2].mxu0 %vm458_vm4, %v441_v19  ;;  %v2453_v19 = vshra.s32 %v568_v4, 4 }
 0x3a8   : > { %v2470_v47 = vshra.s32 %v572_v17, 4 }
 0x3a9   : > { %3355 = vst [vmem:[#allocation16_spill] sm:$0xff] %v2453_v19 }
 0x3aa   : > { %3361 = vst [vmem:[#allocation22_spill] sm:$0xff] %v2470_v47 }
 0x47a   : > { %v528_v56 = vpop.f32.mrb[2].mxu0 }
 0x47b   : > { %v533_v61 = vadd.f32 1.0, %v528_v56  ;;  %v530_v62 = vpop.f32.mrb[3].mxu0  ;;  %v575_v56 = vadd.s32 184, %v2352_v28 }
 0x47c   : > { %v534_v2 = vadd.f32 1.0, %v530_v62  ;;  %v2478_v62 = vand.u32 15, %v573_v21 }
 0x47d   : > { %v535_v6 = vmul.f32 16.0, %v533_v61  ;;  %v2476_v61 = vand.u32 15, %v572_v17 }
 0x47e   : > { %v536_v10 = vmul.f32 16.0, %v534_v2  ;;  %3364 = vst [vmem:[#allocation25_spill] sm:$0xff] %v2478_v62 }
 0x47f   : > { %v1637_v14 = vadd.f32 -1.0, %v535_v6  ;;  %3363 = vst [vmem:[#allocation24_spill] sm:$0xff] %v2476_v61  ;;  %v2482_v6 = vshra.s32 %v575_v56, 4 }
 0x480   : > { %v1638_v18 = vadd.f32 -1.0, %v536_v10 }
 0x481   : > { %v539_v22 = vmul.f32 0.5, %v1637_v14  ;;  %3366 = vst [vmem:[#allocation27_spill] sm:$0xff] %v2482_v6  ;;  %v2486_v14 = vand.u32 15, %v575_v56 }
 0x482   : > { %v540_v35 = vmul.f32 0.5, %v1638_v18 }
 0x483   : > { %v541_v43 = vfloor.f32 %v539_v22  ;;  %3368 = vst [vmem:[#allocation29_spill] sm:$0xff] %v2486_v14 }
 0x484   : > { %v542_v59 = vfloor.f32 %v540_v35 }
 0x485   : > { %v543_v2 = vsub.f32 %v539_v22, %v541_v43  ;;  %v1802_v4 = vtrunc.f32 %v541_v43 }
 0x486   : > { %v544_v9 = vsub.f32 %v540_v35, %v542_v59  ;;  %v1804_v10 = vtrunc.f32 %v542_v59 }
 0x487   : > { %v545_v18 = vsub.f32 1.0, %v543_v2  ;;  %v1803_v28 = vcvt.f32.s32 %v1802_v4  ;;  %v2489_v60 = vrot.slane %v543_v2, %v2358_v30  ;;  %v2492_v17 = vrot.slane %v543_v2, %v2368_v23 }
 0x488   : > { %v546_v21 = vsub.f32 1.0, %v544_v9  ;;  %v1805_v22 = vcvt.f32.s32 %v1804_v10  ;;  %v2495_v43 = vrot.slane %v544_v9, %v2358_v30  ;;  %v2498_v35 = vrot.slane %v544_v9, %v2368_v23 }
 0x489   : > { %v549_v51 = vadd.s32 1, %v1803_v28  ;;  %v2501_v56 = vrot.slane %v1803_v28, %v2358_v30  ;;  %v2504_v59 = vrot.slane %v545_v18, %v2358_v30  ;;  %v2507_v4 = vrot.slane %v1803_v28, %v2368_v23 }
 0x48a   : > { %v2510_v2 = vrot.slane %v545_v18, %v2368_v23  ;;  %v550_v10 = vadd.s32 1, %v1805_v22  ;;  %v2513_v6 = vrot.slane %v1805_v22, %v2358_v30  ;;  %v2516_v9 = vrot.slane %v546_v21, %v2358_v30 }
 0x48b   : > { %v2519_v5 = vrot.slane %v549_v51, %v2358_v30  ;;  %v2522_v14 = vrot.slane %v549_v51, %v2368_v23  ;;  %v2525_v13 = vrot.slane %v1805_v22, %v2368_v23  ;;  %v2528_v28 = vrot.slane %v546_v21, %v2368_v23 }
 0x48c   : > { %v2531_v18 = vrot.slane %v550_v10, %v2358_v30  ;;  %v2534_v47 = vrot.slane %v550_v10, %v2368_v23  ;;  %vm657_vm5 = vcmp.eq.s32.totalorder %v2378_v29, %v2513_v6  ;;  %vm659_vm6 = vcmp.eq.s32.totalorder %v2381_v32, %v2513_v6 }
 0x48d   : > { %v729_v51 = vsel %vm657_vm5, %v2516_v9, 0.0  ;;  %v731_v22 = vsel %vm659_vm6, %v2516_v9, 0.0  ;;  %vm1009_vm7 = vcmp.eq.s32.totalorder %v2373_v26, %v2525_v13  ;;  %vm1011_vm8 = vcmp.eq.s32.totalorder %v2375_v27, %v2525_v13 }
 0x48e   : > { %vm801_vm9 = vcmp.eq.s32.totalorder %v2378_v29, %v2531_v18  ;;  %vm803_vm10 = vcmp.eq.s32.totalorder %v2381_v32, %v2531_v18  ;;  %v1081_v30 = vsel %vm1009_vm7, %v2528_v28, 0.0  ;;  %v1083_v23 = vsel %vm1011_vm8, %v2528_v28, 0.0 }
 0x48f   : > { %v873_v21 = vsel %vm801_vm9, %v2495_v43, 0.0  ;;  %v875_v10 = vsel %vm803_vm10, %v2495_v43, 0.0  ;;  %vm1153_vm11 = vcmp.eq.s32.totalorder %v2373_v26, %v2534_v47  ;;  %vm1155_vm12 = vcmp.eq.s32.totalorder %v2375_v27, %v2534_v47 }
 0x490   : > { %v937_v62 = vadd.f32 %v873_v21, %v729_v51  ;;  %v939_v61 = vadd.f32 %v875_v10, %v731_v22  ;;  %v1225_v38 = vsel %vm1153_vm11, %v2498_v35, 0.0  ;;  %v1227_v31 = vsel %vm1155_vm12, %v2498_v35, 0.0 }
 0x491   : > { %v1289_v42 = vadd.f32 %v1225_v38, %v1081_v30  ;;  %v1291_v39 = vadd.f32 %v1227_v31, %v1083_v23  ;;  %vm656_vm13 = vcmp.eq.s32.totalorder %v2378_v29, %v2501_v56  ;;  %vm658_vm14 = vcmp.eq.s32.totalorder %v2381_v32, %v2501_v56 }
 0x492   : > { %v728_v20 = vsel %vm656_vm13, %v2504_v59, 0.0  ;;  %v730_v19 = vsel %vm658_vm14, %v2504_v59, 0.0  ;;  %vm800_vm15 = vcmp.eq.s32.totalorder %v2378_v29, %v2519_v5  ;;  %vm802_vm0 = vcmp.eq.s32.totalorder %v2381_v32, %v2519_v5 }
 0x493   : > { %v1353_v51 = vmul.f32 %v1289_v42, %v937_v62  ;;  %v1355_v22 = vmul.f32 %v1291_v39, %v939_v61  ;;  %v872_v31 = vsel %vm800_vm15, %v2489_v60, 0.0  ;;  %v874_v38 = vsel %vm802_vm0, %v2489_v60, 0.0 }
 0x494   : > { %v936_v30 = vadd.f32 %v872_v31, %v728_v20  ;;  %v938_v23 = vadd.f32 %v874_v38, %v730_v19  ;;  %vm1008_vm1 = vcmp.eq.s32.totalorder %v2373_v26, %v2507_v4  ;;  %vm1010_vm2 = vcmp.eq.s32.totalorder %v2375_v27, %v2507_v4 }
 0x495   : > { %v1738_v21 = vpack.c.bf16 %v1355_v22, %v1353_v51  ;;  %v1080_v29 = vsel %vm1008_vm1, %v2510_v2, 0.0  ;;  %v1082_v10 = vsel %vm1010_vm2, %v2510_v2, 0.0  ;;  %vm1152_vm3 = vcmp.eq.s32.totalorder %v2373_v26, %v2522_v14 }
 0x496   : > { %vm1154_vm4 = vcmp.eq.s32.totalorder %v2375_v27, %v2522_v14  ;;  %v1224_v32 = vsel %vm1152_vm3, %v2492_v17, 0.0  ;;  %vm661_vm5 = vcmp.eq.s32.totalorder %v2388_v36, %v2513_v6  ;;  %vm663_vm6 = vcmp.eq.s32.totalorder %v2390_v37, %v2513_v6 }
 0x497   : > { %1739 = vmatprep.subr.bf16.mxu1 %v1738_v21  ;;  %v1226_v19 = vsel %vm1154_vm4, %v2492_v17, 0.0  ;;  %v1288_v20 = vadd.f32 %v1224_v32, %v1080_v29  ;;  %v733_v39 = vsel %vm661_vm5, %v2516_v9, 0.0  ;;  %v735_v42 = vsel %vm663_vm6, %v2516_v9, 0.0 }
 0x498   : > { %v1290_v26 = vadd.f32 %v1226_v19, %v1082_v10  ;;  %vm805_vm7 = vcmp.eq.s32.totalorder %v2388_v36, %v2531_v18  ;;  %vm807_vm8 = vcmp.eq.s32.totalorder %v2390_v37, %v2531_v18  ;;  %vm1013_vm9 = vcmp.eq.s32.totalorder %v2383_v33, %v2525_v13 }
 0x499   : > { %v1352_v27 = vmul.f32 %v1288_v20, %v936_v30  ;;  %v877_v61 = vsel %vm805_vm7, %v2495_v43, 0.0  ;;  %v879_v62 = vsel %vm807_vm8, %v2495_v43, 0.0  ;;  %vm1015_vm10 = vcmp.eq.s32.totalorder %v2385_v34, %v2525_v13 }
 0x49a   : > { %v1354_v51 = vmul.f32 %v1290_v26, %v938_v23  ;;  %v941_v22 = vadd.f32 %v877_v61, %v733_v39  ;;  %v943_v31 = vadd.f32 %v879_v62, %v735_v42  ;;  %v1085_v38 = vsel %vm1013_vm9, %v2528_v28, 0.0 }
 0x49b   : > { %v1087_v21 = vsel %vm1015_vm10, %v2528_v28, 0.0  ;;  %vm1157_vm11 = vcmp.eq.s32.totalorder %v2383_v33, %v2534_v47  ;;  %vm1159_vm12 = vcmp.eq.s32.totalorder %v2385_v34, %v2534_v47  ;;  %vm660_vm13 = vcmp.eq.s32.totalorder %v2388_v36, %v2501_v56 }
 0x49c   : > { %v1740_v30 = vpack.c.bf16 %v1354_v51, %v1352_v27  ;;  %v1229_v29 = vsel %vm1157_vm11, %v2498_v35, 0.0  ;;  %v1231_v23 = vsel %vm1159_vm12, %v2498_v35, 0.0  ;;  %vm662_vm14 = vcmp.eq.s32.totalorder %v2390_v37, %v2501_v56 }
 0x49d   : > { %v1293_v10 = vadd.f32 %v1229_v29, %v1085_v38  ;;  %v1295_v32 = vadd.f32 %v1231_v23, %v1087_v21  ;;  %v732_v19 = vsel %vm660_vm13, %v2504_v59, 0.0  ;;  %v734_v20 = vsel %vm662_vm14, %v2504_v59, 0.0 }
 0x49e   : > { %1741 = vmatpush1.bf16.msra.mxu1 %v1740_v30  ;;  %vm804_vm15 = vcmp.eq.s32.totalorder %v2388_v36, %v2519_v5  ;;  %vm806_vm0 = vcmp.eq.s32.totalorder %v2390_v37, %v2519_v5  ;;  %vm1012_vm1 = vcmp.eq.s32.totalorder %v2383_v33, %v2507_v4  ;;  %vm1014_vm2 = vcmp.eq.s32.totalorder %v2385_v34, %v2507_v4 }
 0x49f   : > { %v1357_v39 = vmul.f32 %v1293_v10, %v941_v22  ;;  %v1359_v42 = vmul.f32 %v1295_v32, %v943_v31  ;;  %v876_v26 = vsel %vm804_vm15, %v2489_v60, 0.0  ;;  %v878_v27 = vsel %vm806_vm0, %v2489_v60, 0.0 }
 0x4a0   : > { %v940_v61 = vadd.f32 %v876_v26, %v732_v19  ;;  %v942_v62 = vadd.f32 %v878_v27, %v734_v20  ;;  %v1084_v51 = vsel %vm1012_vm1, %v2510_v2, 0.0  ;;  %v1086_v36 = vsel %vm1014_vm2, %v2510_v2, 0.0 }
 0x4a1   : > { %v1742_v38 = vpack.c.bf16 %v1359_v42, %v1357_v39  ;;  %vm1156_vm3 = vcmp.eq.s32.totalorder %v2383_v33, %v2522_v14  ;;  %vm1158_vm4 = vcmp.eq.s32.totalorder %v2385_v34, %v2522_v14  ;;  %vm665_vm5 = vcmp.eq.s32.totalorder %v2400_v44, %v2513_v6 }
 0x4a2   : > { %v1228_v37 = vsel %vm1156_vm3, %v2492_v17, 0.0  ;;  %v1230_v22 = vsel %vm1158_vm4, %v2492_v17, 0.0  ;;  %vm667_vm6 = vcmp.eq.s32.totalorder %v2402_v45, %v2513_v6  ;;  %v737_v31 = vsel %vm665_vm5, %v2516_v9, 0.0 }
 0x4a3   : > { %1743 = vmatprep.subr.bf16.mxu1 %v1742_v38  ;;  %v1292_v21 = vadd.f32 %v1228_v37, %v1084_v51  ;;  %v1294_v30 = vadd.f32 %v1230_v22, %v1086_v36  ;;  %v739_v33 = vsel %vm667_vm6, %v2516_v9, 0.0  ;;  %vm809_vm7 = vcmp.eq.s32.totalorder %v2400_v44, %v2531_v18 }
 0x4a4   : > { %vm811_vm8 = vcmp.eq.s32.totalorder %v2402_v45, %v2531_v18  ;;  %v881_v34 = vsel %vm809_vm7, %v2495_v43, 0.0  ;;  %vm1017_vm9 = vcmp.eq.s32.totalorder %v2394_v40, %v2525_v13  ;;  %vm1019_vm10 = vcmp.eq.s32.totalorder %v2396_v41, %v2525_v13 }
 0x4a5   : > { %v1356_v29 = vmul.f32 %v1292_v21, %v940_v61  ;;  %v1358_v23 = vmul.f32 %v1294_v30, %v942_v62  ;;  %v883_v10 = vsel %vm811_vm8, %v2495_v43, 0.0  ;;  %v945_v32 = vadd.f32 %v881_v34, %v737_v31 }
 0x4a6   : > { %v947_v19 = vadd.f32 %v883_v10, %v739_v33  ;;  %v1089_v20 = vsel %vm1017_vm9, %v2528_v28, 0.0  ;;  %v1091_v39 = vsel %vm1019_vm10, %v2528_v28, 0.0  ;;  %vm1161_vm11 = vcmp.eq.s32.totalorder %v2394_v40, %v2534_v47 }
 0x4a7   : > { %v1744_v42 = vpack.c.bf16 %v1358_v23, %v1356_v29  ;;  %vm1163_vm12 = vcmp.eq.s32.totalorder %v2396_v41, %v2534_v47  ;;  %v1233_v26 = vsel %vm1161_vm11, %v2498_v35, 0.0  ;;  %vm664_vm13 = vcmp.eq.s32.totalorder %v2400_v44, %v2501_v56 }
 0x4a8   : > { %v1235_v27 = vsel %vm1163_vm12, %v2498_v35, 0.0  ;;  %v1297_v61 = vadd.f32 %v1233_v26, %v1089_v20  ;;  %vm666_vm14 = vcmp.eq.s32.totalorder %v2402_v45, %v2501_v56  ;;  %v736_v62 = vsel %vm664_vm13, %v2504_v59, 0.0 }
 0x4a9   : > { %1745 = vmatpush1.bf16.msra.mxu1 %v1744_v42  ;;  %v1299_v51 = vadd.f32 %v1235_v27, %v1091_v39  ;;  %v738_v36 = vsel %vm666_vm14, %v2504_v59, 0.0  ;;  %vm808_vm15 = vcmp.eq.s32.totalorder %v2400_v44, %v2519_v5  ;;  %vm810_vm0 = vcmp.eq.s32.totalorder %v2402_v45, %v2519_v5 }
 0x4aa   : > { %v1361_v38 = vmul.f32 %v1297_v61, %v945_v32  ;;  %v880_v37 = vsel %vm808_vm15, %v2489_v60, 0.0  ;;  %v882_v22 = vsel %vm810_vm0, %v2489_v60, 0.0  ;;  %vm1016_vm1 = vcmp.eq.s32.totalorder %v2394_v40, %v2507_v4 }
 0x4ab   : > { %v1363_v31 = vmul.f32 %v1299_v51, %v947_v19  ;;  %v944_v21 = vadd.f32 %v880_v37, %v736_v62  ;;  %v946_v30 = vadd.f32 %v882_v22, %v738_v36  ;;  %vm1018_vm2 = vcmp.eq.s32.totalorder %v2396_v41, %v2507_v4 }
 0x4ac   : > { %v1088_v33 = vsel %vm1016_vm1, %v2510_v2, 0.0  ;;  %v1090_v44 = vsel %vm1018_vm2, %v2510_v2, 0.0  ;;  %vm1160_vm3 = vcmp.eq.s32.totalorder %v2394_v40, %v2522_v14  ;;  %vm1162_vm4 = vcmp.eq.s32.totalorder %v2396_v41, %v2522_v14 }
 0x4ad   : > { %v1746_v45 = vpack.c.bf16 %v1363_v31, %v1361_v38  ;;  %v1232_v34 = vsel %vm1160_vm3, %v2492_v17, 0.0  ;;  %v1234_v29 = vsel %vm1162_vm4, %v2492_v17, 0.0  ;;  %vm669_vm5 = vcmp.eq.s32.totalorder %v2409_v49, %v2513_v6 }
 0x4ae   : > { %v1296_v23 = vadd.f32 %v1232_v34, %v1088_v33  ;;  %v1298_v10 = vadd.f32 %v1234_v29, %v1090_v44  ;;  %vm671_vm6 = vcmp.eq.s32.totalorder %v2411_v50, %v2513_v6  ;;  %v741_v32 = vsel %vm669_vm5, %v2516_v9, 0.0 }
 0x4af   : > { %1747 = vmatprep.subr.bf16.mxu1 %v1746_v45  ;;  %v743_v40 = vsel %vm671_vm6, %v2516_v9, 0.0  ;;  %vm813_vm7 = vcmp.eq.s32.totalorder %v2409_v49, %v2531_v18  ;;  %vm815_vm8 = vcmp.eq.s32.totalorder %v2411_v50, %v2531_v18  ;;  %vm1021_vm9 = vcmp.eq.s32.totalorder %v2404_v46, %v2525_v13 }
 0x4b0   : > { %v1360_v41 = vmul.f32 %v1296_v23, %v944_v21  ;;  %v1362_v19 = vmul.f32 %v1298_v10, %v946_v30  ;;  %v885_v20 = vsel %vm813_vm7, %v2495_v43, 0.0  ;;  %v887_v39 = vsel %vm815_vm8, %v2495_v43, 0.0 }
 0x4b1   : > { %v949_v42 = vadd.f32 %v885_v20, %v741_v32  ;;  %v951_v26 = vadd.f32 %v887_v39, %v743_v40  ;;  %vm1023_vm10 = vcmp.eq.s32.totalorder %v2407_v48, %v2525_v13  ;;  %v1093_v27 = vsel %vm1021_vm9, %v2528_v28, 0.0 }
 0x4b2   : > { %v1748_v61 = vpack.c.bf16 %v1362_v19, %v1360_v41  ;;  %v1095_v62 = vsel %vm1023_vm10, %v2528_v28, 0.0  ;;  %vm1165_vm11 = vcmp.eq.s32.totalorder %v2404_v46, %v2534_v47  ;;  %vm1167_vm12 = vcmp.eq.s32.totalorder %v2407_v48, %v2534_v47 }
 0x4b3   : > { %v1237_v51 = vsel %vm1165_vm11, %v2498_v35, 0.0  ;;  %v1239_v36 = vsel %vm1167_vm12, %v2498_v35, 0.0  ;;  %vm668_vm13 = vcmp.eq.s32.totalorder %v2409_v49, %v2501_v56  ;;  %vm670_vm14 = vcmp.eq.s32.totalorder %v2411_v50, %v2501_v56 }
 0x4b4   : > { %1749 = vmatpush1.bf16.msra.mxu1 %v1748_v61  ;;  %v1301_v38 = vadd.f32 %v1237_v51, %v1093_v27  ;;  %v1303_v37 = vadd.f32 %v1239_v36, %v1095_v62  ;;  %v740_v22 = vsel %vm668_vm13, %v2504_v59, 0.0  ;;  %v742_v31 = vsel %vm670_vm14, %v2504_v59, 0.0 }
 0x4b5   : > { %vm812_vm15 = vcmp.eq.s32.totalorder %v2409_v49, %v2519_v5  ;;  %vm814_vm0 = vcmp.eq.s32.totalorder %v2411_v50, %v2519_v5  ;;  %vm1020_vm1 = vcmp.eq.s32.totalorder %v2404_v46, %v2507_v4  ;;  %vm1022_vm2 = vcmp.eq.s32.totalorder %v2407_v48, %v2507_v4 }
 0x4b6   : > { %v1365_v21 = vmul.f32 %v1301_v38, %v949_v42  ;;  %v1367_v30 = vmul.f32 %v1303_v37, %v951_v26  ;;  %v884_v33 = vsel %vm812_vm15, %v2489_v60, 0.0  ;;  %v886_v44 = vsel %vm814_vm0, %v2489_v60, 0.0 }
 0x4b7   : > { %v948_v45 = vadd.f32 %v884_v33, %v740_v22  ;;  %v950_v34 = vadd.f32 %v886_v44, %v742_v31  ;;  %v1092_v29 = vsel %vm1020_vm1, %v2510_v2, 0.0  ;;  %v1094_v49 = vsel %vm1022_vm2, %v2510_v2, 0.0 }
 0x4b8   : > { %v1750_v23 = vpack.c.bf16 %v1367_v30, %v1365_v21  ;;  %vm1164_vm3 = vcmp.eq.s32.totalorder %v2404_v46, %v2522_v14  ;;  %vm1166_vm4 = vcmp.eq.s32.totalorder %v2407_v48, %v2522_v14  ;;  %vm673_vm5 = vcmp.eq.s32.totalorder %v2418_v54, %v2513_v6 }
 0x4b9   : > { %v1236_v50 = vsel %vm1164_vm3, %v2492_v17, 0.0  ;;  %v1238_v10 = vsel %vm1166_vm4, %v2492_v17, 0.0  ;;  %vm675_vm6 = vcmp.eq.s32.totalorder %v2420_v55, %v2513_v6  ;;  %v745_v32 = vsel %vm673_vm5, %v2516_v9, 0.0 }
 0x4ba   : > { %1751 = vmatprep.subr.bf16.mxu1 %v1750_v23  ;;  %v1300_v40 = vadd.f32 %v1236_v50, %v1092_v29  ;;  %v1302_v41 = vadd.f32 %v1238_v10, %v1094_v49  ;;  %v747_v46 = vsel %vm675_vm6, %v2516_v9, 0.0  ;;  %vm817_vm7 = vcmp.eq.s32.totalorder %v2418_v54, %v2531_v18 }
 0x4bb   : > { %vm819_vm8 = vcmp.eq.s32.totalorder %v2420_v55, %v2531_v18  ;;  %v889_v48 = vsel %vm817_vm7, %v2495_v43, 0.0  ;;  %vm1025_vm9 = vcmp.eq.s32.totalorder %v2414_v52, %v2525_v13  ;;  %vm1027_vm10 = vcmp.eq.s32.totalorder %v2416_v53, %v2525_v13 }
 0x4bc   : > { %v1364_v19 = vmul.f32 %v1300_v40, %v948_v45  ;;  %v1366_v20 = vmul.f32 %v1302_v41, %v950_v34  ;;  %v891_v39 = vsel %vm819_vm8, %v2495_v43, 0.0  ;;  %v953_v42 = vadd.f32 %v889_v48, %v745_v32 }
 0x4bd   : > { %v955_v26 = vadd.f32 %v891_v39, %v747_v46  ;;  %v1097_v27 = vsel %vm1025_vm9, %v2528_v28, 0.0  ;;  %v1099_v61 = vsel %vm1027_vm10, %v2528_v28, 0.0  ;;  %vm1169_vm11 = vcmp.eq.s32.totalorder %v2414_v52, %v2534_v47 }
 0x4be   : > { %v1752_v62 = vpack.c.bf16 %v1366_v20, %v1364_v19  ;;  %vm1171_vm12 = vcmp.eq.s32.totalorder %v2416_v53, %v2534_v47  ;;  %v1241_v51 = vsel %vm1169_vm11, %v2498_v35, 0.0  ;;  %vm672_vm13 = vcmp.eq.s32.totalorder %v2418_v54, %v2501_v56 }
 0x4bf   : > { %v1243_v36 = vsel %vm1171_vm12, %v2498_v35, 0.0  ;;  %v1305_v38 = vadd.f32 %v1241_v51, %v1097_v27  ;;  %vm674_vm14 = vcmp.eq.s32.totalorder %v2420_v55, %v2501_v56  ;;  %v744_v37 = vsel %vm672_vm13, %v2504_v59, 0.0 }
 0x4c0   : > { %1753 = vmatpush1.bf16.msra.mxu1 %v1752_v62  ;;  %v1307_v22 = vadd.f32 %v1243_v36, %v1099_v61  ;;  %v746_v31 = vsel %vm674_vm14, %v2504_v59, 0.0  ;;  %vm816_vm15 = vcmp.eq.s32.totalorder %v2418_v54, %v2519_v5  ;;  %vm818_vm0 = vcmp.eq.s32.totalorder %v2420_v55, %v2519_v5 }
 0x4c1   : > { %v1369_v21 = vmul.f32 %v1305_v38, %v953_v42  ;;  %v888_v30 = vsel %vm816_vm15, %v2489_v60, 0.0  ;;  %v890_v33 = vsel %vm818_vm0, %v2489_v60, 0.0  ;;  %vm1024_vm1 = vcmp.eq.s32.totalorder %v2414_v52, %v2507_v4 }
 0x4c2   : > { %v1371_v44 = vmul.f32 %v1307_v22, %v955_v26  ;;  %v952_v45 = vadd.f32 %v888_v30, %v744_v37  ;;  %v954_v34 = vadd.f32 %v890_v33, %v746_v31  ;;  %vm1026_vm2 = vcmp.eq.s32.totalorder %v2416_v53, %v2507_v4 }
 0x4c3   : > { %v1096_v29 = vsel %vm1024_vm1, %v2510_v2, 0.0  ;;  %v1098_v54 = vsel %vm1026_vm2, %v2510_v2, 0.0  ;;  %vm1168_vm3 = vcmp.eq.s32.totalorder %v2414_v52, %v2522_v14  ;;  %vm1170_vm4 = vcmp.eq.s32.totalorder %v2416_v53, %v2522_v14 }
 0x4c4   : > { %v1754_v55 = vpack.c.bf16 %v1371_v44, %v1369_v21  ;;  %v1240_v49 = vsel %vm1168_vm3, %v2492_v17, 0.0  ;;  %v1242_v23 = vsel %vm1170_vm4, %v2492_v17, 0.0  ;;  %vm677_vm5 = vcmp.eq.s32.totalorder %v2428_v63, %v2513_v6 }
 0x4c5   : > { %v1304_v50 = vadd.f32 %v1240_v49, %v1096_v29  ;;  %v1306_v10 = vadd.f32 %v1242_v23, %v1098_v54  ;;  %vm679_vm6 = vcmp.eq.s32.totalorder %v2430_v0, %v2513_v6  ;;  %v749_v32 = vsel %vm677_vm5, %v2516_v9, 0.0 }
 0x4c6   : > { %1755 = vmatprep.subr.bf16.mxu1 %v1754_v55  ;;  %v751_v52 = vsel %vm679_vm6, %v2516_v9, 0.0  ;;  %vm821_vm7 = vcmp.eq.s32.totalorder %v2428_v63, %v2531_v18  ;;  %vm823_vm8 = vcmp.eq.s32.totalorder %v2430_v0, %v2531_v18  ;;  %vm1029_vm9 = vcmp.eq.s32.totalorder %v2422_v57, %v2525_v13 }
 0x4c7   : > { %v1368_v53 = vmul.f32 %v1304_v50, %v952_v45  ;;  %v1370_v40 = vmul.f32 %v1306_v10, %v954_v34  ;;  %v893_v41 = vsel %vm821_vm7, %v2495_v43, 0.0  ;;  %v895_v46 = vsel %vm823_vm8, %v2495_v43, 0.0 }
 0x4c8   : > { %v957_v48 = vadd.f32 %v893_v41, %v749_v32  ;;  %v959_v19 = vadd.f32 %v895_v46, %v751_v52  ;;  %vm1031_vm10 = vcmp.eq.s32.totalorder %v2424_v58, %v2525_v13  ;;  %v1101_v20 = vsel %vm1029_vm9, %v2528_v28, 0.0 }
 0x4c9   : > { %v1756_v39 = vpack.c.bf16 %v1370_v40, %v1368_v53  ;;  %v1103_v42 = vsel %vm1031_vm10, %v2528_v28, 0.0  ;;  %vm1173_vm11 = vcmp.eq.s32.totalorder %v2422_v57, %v2534_v47  ;;  %vm1175_vm12 = vcmp.eq.s32.totalorder %v2424_v58, %v2534_v47 }
 0x4ca   : > { %v1245_v26 = vsel %vm1173_vm11, %v2498_v35, 0.0  ;;  %v1247_v27 = vsel %vm1175_vm12, %v2498_v35, 0.0  ;;  %vm676_vm13 = vcmp.eq.s32.totalorder %v2428_v63, %v2501_v56  ;;  %vm678_vm14 = vcmp.eq.s32.totalorder %v2430_v0, %v2501_v56 }
 0x4cb   : > { %1757 = vmatpush1.bf16.msra.mxu1 %v1756_v39  ;;  %v1309_v61 = vadd.f32 %v1245_v26, %v1101_v20  ;;  %v1311_v62 = vadd.f32 %v1247_v27, %v1103_v42  ;;  %v748_v51 = vsel %vm676_vm13, %v2504_v59, 0.0  ;;  %v750_v36 = vsel %vm678_vm14, %v2504_v59, 0.0 }
 0x4cc   : > { %vm820_vm15 = vcmp.eq.s32.totalorder %v2428_v63, %v2519_v5  ;;  %vm822_vm0 = vcmp.eq.s32.totalorder %v2430_v0, %v2519_v5  ;;  %vm1028_vm1 = vcmp.eq.s32.totalorder %v2422_v57, %v2507_v4  ;;  %vm1030_vm2 = vcmp.eq.s32.totalorder %v2424_v58, %v2507_v4 }
 0x4cd   : > { %v1373_v38 = vmul.f32 %v1309_v61, %v957_v48  ;;  %v1375_v37 = vmul.f32 %v1311_v62, %v959_v19  ;;  %v892_v22 = vsel %vm820_vm15, %v2489_v60, 0.0  ;;  %v894_v31 = vsel %vm822_vm0, %v2489_v60, 0.0 }
 0x4ce   : > { %v956_v21 = vadd.f32 %v892_v22, %v748_v51  ;;  %v958_v30 = vadd.f32 %v894_v31, %v750_v36  ;;  %v1100_v33 = vsel %vm1028_vm1, %v2510_v2, 0.0  ;;  %v1102_v63 = vsel %vm1030_vm2, %v2510_v2, 0.0 }
 0x4cf   : > { %v1758_v44 = vpack.c.bf16 %v1375_v37, %v1373_v38  ;;  %vm1172_vm3 = vcmp.eq.s32.totalorder %v2422_v57, %v2522_v14  ;;  %vm1174_vm4 = vcmp.eq.s32.totalorder %v2424_v58, %v2522_v14  ;;  %vm681_vm5 = vcmp.eq.s32.totalorder %v2438_v7, %v2513_v6 }
 0x4d0   : > { %v1244_v0 = vsel %vm1172_vm3, %v2492_v17, 0.0  ;;  %v1246_v45 = vsel %vm1174_vm4, %v2492_v17, 0.0  ;;  %vm683_vm6 = vcmp.eq.s32.totalorder %v2440_v8, %v2513_v6  ;;  %v753_v34 = vsel %vm681_vm5, %v2516_v9, 0.0 }
 0x4d1   : > { %1759 = vmatprep.subr.bf16.mxu1 %v1758_v44  ;;  %v1308_v29 = vadd.f32 %v1244_v0, %v1100_v33  ;;  %v1310_v54 = vadd.f32 %v1246_v45, %v1102_v63  ;;  %v755_v57 = vsel %vm683_vm6, %v2516_v9, 0.0  ;;  %vm825_vm7 = vcmp.eq.s32.totalorder %v2438_v7, %v2531_v18 }
 0x4d2   : > { %vm827_vm8 = vcmp.eq.s32.totalorder %v2440_v8, %v2531_v18  ;;  %v897_v58 = vsel %vm825_vm7, %v2495_v43, 0.0  ;;  %vm1033_vm9 = vcmp.eq.s32.totalorder %v2432_v1, %v2525_v13  ;;  %vm1035_vm10 = vcmp.eq.s32.totalorder %v2434_v3, %v2525_v13 }
 0x4d3   : > { %v1372_v55 = vmul.f32 %v1308_v29, %v956_v21  ;;  %v1374_v49 = vmul.f32 %v1310_v54, %v958_v30  ;;  %v899_v23 = vsel %vm827_vm8, %v2495_v43, 0.0  ;;  %v961_v50 = vadd.f32 %v897_v58, %v753_v34 }
 0x4d4   : > { %v963_v10 = vadd.f32 %v899_v23, %v755_v57  ;;  %v1105_v32 = vsel %vm1033_vm9, %v2528_v28, 0.0  ;;  %v1107_v52 = vsel %vm1035_vm10, %v2528_v28, 0.0  ;;  %vm1177_vm11 = vcmp.eq.s32.totalorder %v2432_v1, %v2534_v47 }
 0x4d5   : > { %v1760_v53 = vpack.c.bf16 %v1374_v49, %v1372_v55  ;;  %vm1179_vm12 = vcmp.eq.s32.totalorder %v2434_v3, %v2534_v47  ;;  %v1249_v40 = vsel %vm1177_vm11, %v2498_v35, 0.0  ;;  %vm680_vm13 = vcmp.eq.s32.totalorder %v2438_v7, %v2501_v56 }
 0x4d6   : > { %v1251_v41 = vsel %vm1179_vm12, %v2498_v35, 0.0  ;;  %v1313_v46 = vadd.f32 %v1249_v40, %v1105_v32  ;;  %vm682_vm14 = vcmp.eq.s32.totalorder %v2440_v8, %v2501_v56  ;;  %v752_v48 = vsel %vm680_vm13, %v2504_v59, 0.0 }
 0x4d7   : > { %1761 = vmatpush1.bf16.msra.mxu1 %v1760_v53  ;;  %v1315_v19 = vadd.f32 %v1251_v41, %v1107_v52  ;;  %v754_v20 = vsel %vm682_vm14, %v2504_v59, 0.0  ;;  %vm824_vm15 = vcmp.eq.s32.totalorder %v2438_v7, %v2519_v5  ;;  %vm826_vm0 = vcmp.eq.s32.totalorder %v2440_v8, %v2519_v5 }
 0x4d8   : > { %v1377_v39 = vmul.f32 %v1313_v46, %v961_v50  ;;  %v896_v42 = vsel %vm824_vm15, %v2489_v60, 0.0  ;;  %v898_v26 = vsel %vm826_vm0, %v2489_v60, 0.0  ;;  %vm1032_vm1 = vcmp.eq.s32.totalorder %v2432_v1, %v2507_v4 }
 0x4d9   : > { %v1379_v27 = vmul.f32 %v1315_v19, %v963_v10  ;;  %v960_v61 = vadd.f32 %v896_v42, %v752_v48  ;;  %v962_v62 = vadd.f32 %v898_v26, %v754_v20  ;;  %vm1034_vm2 = vcmp.eq.s32.totalorder %v2434_v3, %v2507_v4  ;;  %v3370_v42 = vld [vmem:[#allocation17_spill] sm:$0xff] }
 0x4da   : > { %v1104_v51 = vsel %vm1032_vm1, %v2510_v2, 0.0  ;;  %v1106_v7 = vsel %vm1034_vm2, %v2510_v2, 0.0  ;;  %vm1176_vm3 = vcmp.eq.s32.totalorder %v2432_v1, %v2522_v14  ;;  %vm1178_vm4 = vcmp.eq.s32.totalorder %v2434_v3, %v2522_v14 }
 0x4db   : > { %v1762_v8 = vpack.c.bf16 %v1379_v27, %v1377_v39  ;;  %v1248_v36 = vsel %vm1176_vm3, %v2492_v17, 0.0  ;;  %v1250_v38 = vsel %vm1178_vm4, %v2492_v17, 0.0  ;;  %vm685_vm5 = vcmp.eq.s32.totalorder %v2448_v15, %v2513_v6  ;;  %v3369_v39 = vld [vmem:[#allocation16_spill] sm:$0xff] }
 0x4dc   : > { %v1312_v37 = vadd.f32 %v1248_v36, %v1104_v51  ;;  %v1314_v22 = vadd.f32 %v1250_v38, %v1106_v7  ;;  %vm687_vm6 = vcmp.eq.s32.totalorder %v2450_v16, %v2513_v6  ;;  %v757_v31 = vsel %vm685_vm5, %v2516_v9, 0.0 }
 0x4dd   : > { %1763 = vmatprep.subr.bf16.mxu1 %v1762_v8  ;;  %v759_v1 = vsel %vm687_vm6, %v2516_v9, 0.0  ;;  %vm829_vm7 = vcmp.eq.s32.totalorder %v2448_v15, %v2531_v18  ;;  %vm831_vm8 = vcmp.eq.s32.totalorder %v2450_v16, %v2531_v18  ;;  %vm1037_vm9 = vcmp.eq.s32.totalorder %v2443_v11, %v2525_v13 }
 0x4de   : > { %v1376_v3 = vmul.f32 %v1312_v37, %v960_v61  ;;  %v1378_v21 = vmul.f32 %v1314_v22, %v962_v62  ;;  %v901_v30 = vsel %vm829_vm7, %v2495_v43, 0.0  ;;  %v903_v33 = vsel %vm831_vm8, %v2495_v43, 0.0 }
 0x4df   : > { %v965_v63 = vadd.f32 %v901_v30, %v757_v31  ;;  %v967_v44 = vadd.f32 %v903_v33, %v759_v1  ;;  %vm1039_vm10 = vcmp.eq.s32.totalorder %v2445_v12, %v2525_v13  ;;  %v1109_v0 = vsel %vm1037_vm9, %v2528_v28, 0.0 }
 0x4e0   : > { %v1764_v45 = vpack.c.bf16 %v1378_v21, %v1376_v3  ;;  %v1111_v34 = vsel %vm1039_vm10, %v2528_v28, 0.0  ;;  %vm1181_vm11 = vcmp.eq.s32.totalorder %v2443_v11, %v2534_v47  ;;  %vm1183_vm12 = vcmp.eq.s32.totalorder %v2445_v12, %v2534_v47 }
 0x4e1   : > { %v1253_v29 = vsel %vm1181_vm11, %v2498_v35, 0.0  ;;  %v1255_v54 = vsel %vm1183_vm12, %v2498_v35, 0.0  ;;  %vm684_vm13 = vcmp.eq.s32.totalorder %v2448_v15, %v2501_v56  ;;  %vm686_vm14 = vcmp.eq.s32.totalorder %v2450_v16, %v2501_v56 }
 0x4e2   : > { %1765 = vmatpush1.bf16.msra.mxu1 %v1764_v45  ;;  %v1317_v57 = vadd.f32 %v1253_v29, %v1109_v0  ;;  %v1319_v58 = vadd.f32 %v1255_v54, %v1111_v34  ;;  %v756_v55 = vsel %vm684_vm13, %v2504_v59, 0.0  ;;  %v758_v49 = vsel %vm686_vm14, %v2504_v59, 0.0  ;;  %v3371_v54 = vld [vmem:[#allocation20_spill] sm:$0xff] }
 0x4e3   : > { %vm828_vm15 = vcmp.eq.s32.totalorder %v2448_v15, %v2519_v5  ;;  %vm830_vm0 = vcmp.eq.s32.totalorder %v2450_v16, %v2519_v5  ;;  %vm1036_vm1 = vcmp.eq.s32.totalorder %v2443_v11, %v2507_v4  ;;  %vm1038_vm2 = vcmp.eq.s32.totalorder %v2445_v12, %v2507_v4 }
 0x4e4   : > { %v1381_v23 = vmul.f32 %v1317_v57, %v965_v63  ;;  %v1383_v50 = vmul.f32 %v1319_v58, %v967_v44  ;;  %v900_v10 = vsel %vm828_vm15, %v2489_v60, 0.0  ;;  %v902_v32 = vsel %vm830_vm0, %v2489_v60, 0.0 }
 0x4e5   : > { %v964_v52 = vadd.f32 %v900_v10, %v756_v55  ;;  %v966_v53 = vadd.f32 %v902_v32, %v758_v49  ;;  %v1108_v40 = vsel %vm1036_vm1, %v2510_v2, 0.0  ;;  %v1110_v15 = vsel %vm1038_vm2, %v2510_v2, 0.0  ;;  %v3372_v55 = vld [vmem:[#allocation21_spill] sm:$0xff] }
 0x4e6   : > { %v1766_v41 = vpack.c.bf16 %v1383_v50, %v1381_v23  ;;  %vm1180_vm3 = vcmp.eq.s32.totalorder %v2443_v11, %v2522_v14  ;;  %vm1182_vm4 = vcmp.eq.s32.totalorder %v2445_v12, %v2522_v14  ;;  %vm689_vm5 = vcmp.eq.s32.totalorder %v2458_v24, %v2513_v6  ;;  %v3373_v50 = vld [vmem:[#allocation18_spill] sm:$0xff] }
 0x4e7   : > { %v1252_v16 = vsel %vm1180_vm3, %v2492_v17, 0.0  ;;  %v1254_v46 = vsel %vm1182_vm4, %v2492_v17, 0.0  ;;  %vm691_vm6 = vcmp.eq.s32.totalorder %v2460_v25, %v2513_v6  ;;  %v761_v48 = vsel %vm689_vm5, %v2516_v9, 0.0 }
 0x4e8   : > { %1767 = vmatprep.subr.bf16.mxu1 %v1766_v41  ;;  %v1316_v19 = vadd.f32 %v1252_v16, %v1108_v40  ;;  %v1318_v20 = vadd.f32 %v1254_v46, %v1110_v15  ;;  %v763_v11 = vsel %vm691_vm6, %v2516_v9, 0.0  ;;  %vm833_vm7 = vcmp.eq.s32.totalorder %v2458_v24, %v2531_v18  ;;  %v3374_v41 = vld [vmem:[#allocation19_spill] sm:$0xff] }
 0x4e9   : > { %vm835_vm8 = vcmp.eq.s32.totalorder %v2460_v25, %v2531_v18  ;;  %v905_v12 = vsel %vm833_vm7, %v2495_v43, 0.0  ;;  %vm1041_vm9 = vcmp.eq.s32.totalorder %v3369_v39, %v2525_v13  ;;  %vm1043_vm10 = vcmp.eq.s32.totalorder %v3370_v42, %v2525_v13 }
 0x4ea   : > { %v1380_v26 = vmul.f32 %v1316_v19, %v964_v52  ;;  %v1382_v27 = vmul.f32 %v1318_v20, %v966_v53  ;;  %v907_v61 = vsel %vm835_vm8, %v2495_v43, 0.0  ;;  %v969_v62 = vadd.f32 %v905_v12, %v761_v48 }
 0x4eb   : > { %v971_v51 = vadd.f32 %v907_v61, %v763_v11  ;;  %v1113_v7 = vsel %vm1041_vm9, %v2528_v28, 0.0  ;;  %v1115_v8 = vsel %vm1043_vm10, %v2528_v28, 0.0  ;;  %vm1185_vm11 = vcmp.eq.s32.totalorder %v3369_v39, %v2534_v47 }
 0x4ec   : > { %v1768_v36 = vpack.c.bf16 %v1382_v27, %v1380_v26  ;;  %vm1187_vm12 = vcmp.eq.s32.totalorder %v3370_v42, %v2534_v47  ;;  %v1257_v38 = vsel %vm1185_vm11, %v2498_v35, 0.0  ;;  %vm688_vm13 = vcmp.eq.s32.totalorder %v2458_v24, %v2501_v56 }
 0x4ed   : > { %v1259_v37 = vsel %vm1187_vm12, %v2498_v35, 0.0  ;;  %v1321_v22 = vadd.f32 %v1257_v38, %v1113_v7  ;;  %vm690_vm14 = vcmp.eq.s32.totalorder %v2460_v25, %v2501_v56  ;;  %v760_v31 = vsel %vm688_vm13, %v2504_v59, 0.0 }
 0x4ee   : > { %1769 = vmatpush1.bf16.msra.mxu1 %v1768_v36  ;;  %v1323_v1 = vadd.f32 %v1259_v37, %v1115_v8  ;;  %v762_v3 = vsel %vm690_vm14, %v2504_v59, 0.0  ;;  %vm832_vm15 = vcmp.eq.s32.totalorder %v2458_v24, %v2519_v5  ;;  %vm834_vm0 = vcmp.eq.s32.totalorder %v2460_v25, %v2519_v5  ;;  %v3375_v37 = vld [vmem:[#allocation24_spill] sm:$0xff] }
 0x4ef   : > { %v1385_v21 = vmul.f32 %v1321_v22, %v969_v62  ;;  %v904_v30 = vsel %vm832_vm15, %v2489_v60, 0.0  ;;  %v906_v33 = vsel %vm834_vm0, %v2489_v60, 0.0  ;;  %vm1040_vm1 = vcmp.eq.s32.totalorder %v3369_v39, %v2507_v4 }
 0x4f0   : > { %v1387_v63 = vmul.f32 %v1323_v1, %v971_v51  ;;  %v968_v44 = vadd.f32 %v904_v30, %v760_v31  ;;  %v970_v0 = vadd.f32 %v906_v33, %v762_v3  ;;  %vm1042_vm2 = vcmp.eq.s32.totalorder %v3370_v42, %v2507_v4  ;;  %v3376_v1 = vld [vmem:[#allocation25_spill] sm:$0xff] }
 0x4f1   : > { %v1112_v45 = vsel %vm1040_vm1, %v2510_v2, 0.0  ;;  %v1114_v24 = vsel %vm1042_vm2, %v2510_v2, 0.0  ;;  %vm1184_vm3 = vcmp.eq.s32.totalorder %v3369_v39, %v2522_v14  ;;  %vm1186_vm4 = vcmp.eq.s32.totalorder %v3370_v42, %v2522_v14 }
 0x4f2   : > { %v1770_v25 = vpack.c.bf16 %v1387_v63, %v1385_v21  ;;  %v1256_v34 = vsel %vm1184_vm3, %v2492_v17, 0.0  ;;  %v1258_v29 = vsel %vm1186_vm4, %v2492_v17, 0.0  ;;  %vm693_vm5 = vcmp.eq.s32.totalorder %v3371_v54, %v2513_v6 }
 0x4f3   : > { %v1320_v57 = vadd.f32 %v1256_v34, %v1112_v45  ;;  %v1322_v58 = vadd.f32 %v1258_v29, %v1114_v24  ;;  %vm695_vm6 = vcmp.eq.s32.totalorder %v3372_v55, %v2513_v6  ;;  %v765_v49 = vsel %vm693_vm5, %v2516_v9, 0.0 }
 0x4f4   : > { %1771 = vmatprep.subr.bf16.mxu1 %v1770_v25  ;;  %v767_v23 = vsel %vm695_vm6, %v2516_v9, 0.0  ;;  %vm837_vm7 = vcmp.eq.s32.totalorder %v3371_v54, %v2531_v18  ;;  %vm839_vm8 = vcmp.eq.s32.totalorder %v3372_v55, %v2531_v18  ;;  %vm1045_vm9 = vcmp.eq.s32.totalorder %v3373_v50, %v2525_v13 }
 0x4f5   : > { %v1384_v10 = vmul.f32 %v1320_v57, %v968_v44  ;;  %v1386_v32 = vmul.f32 %v1322_v58, %v970_v0  ;;  %v909_v52 = vsel %vm837_vm7, %v2495_v43, 0.0  ;;  %v911_v53 = vsel %vm839_vm8, %v2495_v43, 0.0  ;;  %v3377_v44 = vld [vmem:[#allocation22_spill] sm:$0xff]  ;;  %v3378_v0 = vld [vmem:[#allocation23_spill] sm:$0xff] }
 0x4f6   : > { %v973_v40 = vadd.f32 %v909_v52, %v765_v49  ;;  %v975_v15 = vadd.f32 %v911_v53, %v767_v23  ;;  %vm1047_vm10 = vcmp.eq.s32.totalorder %v3374_v41, %v2525_v13  ;;  %v1117_v16 = vsel %vm1045_vm9, %v2528_v28, 0.0 }
 0x4f7   : > { %v1772_v46 = vpack.c.bf16 %v1386_v32, %v1384_v10  ;;  %v1119_v48 = vsel %vm1047_vm10, %v2528_v28, 0.0  ;;  %vm1189_vm11 = vcmp.eq.s32.totalorder %v3373_v50, %v2534_v47  ;;  %vm1191_vm12 = vcmp.eq.s32.totalorder %v3374_v41, %v2534_v47 }
 0x4f8   : > { %v1261_v19 = vsel %vm1189_vm11, %v2498_v35, 0.0  ;;  %v1263_v20 = vsel %vm1191_vm12, %v2498_v35, 0.0  ;;  %vm692_vm13 = vcmp.eq.s32.totalorder %v3371_v54, %v2501_v56  ;;  %vm694_vm14 = vcmp.eq.s32.totalorder %v3372_v55, %v2501_v56 }
 0x4f9   : > { %1773 = vmatpush1.bf16.msra.mxu1 %v1772_v46  ;;  %v1325_v11 = vadd.f32 %v1261_v19, %v1117_v16  ;;  %v1327_v12 = vadd.f32 %v1263_v20, %v1119_v48  ;;  %v764_v39 = vsel %vm692_vm13, %v2504_v59, 0.0  ;;  %v766_v42 = vsel %vm694_vm14, %v2504_v59, 0.0 }
 0x4fa   : > { %vm836_vm15 = vcmp.eq.s32.totalorder %v3371_v54, %v2519_v5  ;;  %vm838_vm0 = vcmp.eq.s32.totalorder %v3372_v55, %v2519_v5  ;;  %vm1044_vm1 = vcmp.eq.s32.totalorder %v3373_v50, %v2507_v4  ;;  %vm1046_vm2 = vcmp.eq.s32.totalorder %v3374_v41, %v2507_v4 }
 0x4fb   : > { %v1389_v26 = vmul.f32 %v1325_v11, %v973_v40  ;;  %v1391_v27 = vmul.f32 %v1327_v12, %v975_v15  ;;  %v908_v61 = vsel %vm836_vm15, %v2489_v60, 0.0  ;;  %v910_v62 = vsel %vm838_vm0, %v2489_v60, 0.0  ;;  %v3379_v12 = vld [vmem:[#allocation28_spill] sm:$0xff] }
 0x4fc   : > { %v972_v51 = vadd.f32 %v908_v61, %v764_v39  ;;  %v974_v7 = vadd.f32 %v910_v62, %v766_v42  ;;  %v1116_v8 = vsel %vm1044_vm1, %v2510_v2, 0.0  ;;  %v1118_v36 = vsel %vm1046_vm2, %v2510_v2, 0.0  ;;  %v3381_v62 = vld [vmem:[#allocation26_spill] sm:$0xff] }
 0x4fd   : > { %v1774_v38 = vpack.c.bf16 %v1391_v27, %v1389_v26  ;;  %vm1188_vm3 = vcmp.eq.s32.totalorder %v3373_v50, %v2522_v14  ;;  %vm1190_vm4 = vcmp.eq.s32.totalorder %v3374_v41, %v2522_v14  ;;  %vm697_vm5 = vcmp.eq.s32.totalorder %v3375_v37, %v2513_v6  ;;  %v3380_v26 = vld [vmem:[#allocation29_spill] sm:$0xff] }
 0x4fe   : > { %v1260_v22 = vsel %vm1188_vm3, %v2492_v17, 0.0  ;;  %v1262_v31 = vsel %vm1190_vm4, %v2492_v17, 0.0  ;;  %vm699_vm6 = vcmp.eq.s32.totalorder %v3376_v1, %v2513_v6  ;;  %v769_v3 = vsel %vm697_vm5, %v2516_v9, 0.0 }
 0x4ff   : > { %1775 = vmatprep.subr.bf16.mxu1 %v1774_v38  ;;  %v1324_v21 = vadd.f32 %v1260_v22, %v1116_v8  ;;  %v1326_v30 = vadd.f32 %v1262_v31, %v1118_v36  ;;  %v771_v33 = vsel %vm699_vm6, %v2516_v9, 0.0  ;;  %vm841_vm7 = vcmp.eq.s32.totalorder %v3375_v37, %v2531_v18  ;;  %v3382_v22 = vld [vmem:[#allocation27_spill] sm:$0xff] }
 0x500   : > { %vm843_vm8 = vcmp.eq.s32.totalorder %v3376_v1, %v2531_v18  ;;  %v913_v63 = vsel %vm841_vm7, %v2495_v43, 0.0  ;;  %vm1049_vm9 = vcmp.eq.s32.totalorder %v3377_v44, %v2525_v13  ;;  %vm1051_vm10 = vcmp.eq.s32.totalorder %v3378_v0, %v2525_v13 }
 0x501   : > { %v1388_v45 = vmul.f32 %v1324_v21, %v972_v51  ;;  %v1390_v24 = vmul.f32 %v1326_v30, %v974_v7  ;;  %v915_v25 = vsel %vm843_vm8, %v2495_v43, 0.0  ;;  %v977_v34 = vadd.f32 %v913_v63, %v769_v3 }
 0x502   : > { %v979_v29 = vadd.f32 %v915_v25, %v771_v33  ;;  %v1121_v54 = vsel %vm1049_vm9, %v2528_v28, 0.0  ;;  %v1123_v57 = vsel %vm1051_vm10, %v2528_v28, 0.0  ;;  %vm1193_vm11 = vcmp.eq.s32.totalorder %v3377_v44, %v2534_v47 }
 0x503   : > { %v1776_v58 = vpack.c.bf16 %v1390_v24, %v1388_v45  ;;  %vm1195_vm12 = vcmp.eq.s32.totalorder %v3378_v0, %v2534_v47  ;;  %v1265_v55 = vsel %vm1193_vm11, %v2498_v35, 0.0  ;;  %vm696_vm13 = vcmp.eq.s32.totalorder %v3375_v37, %v2501_v56 }
 0x504   : > { %v1267_v49 = vsel %vm1195_vm12, %v2498_v35, 0.0  ;;  %v1329_v23 = vadd.f32 %v1265_v55, %v1121_v54  ;;  %vm698_vm14 = vcmp.eq.s32.totalorder %v3376_v1, %v2501_v56  ;;  %v768_v50 = vsel %vm696_vm13, %v2504_v59, 0.0 }
 0x505   : > { %1777 = vmatpush1.bf16.msra.mxu1 %v1776_v58  ;;  %v1331_v10 = vadd.f32 %v1267_v49, %v1123_v57  ;;  %v770_v32 = vsel %vm698_vm14, %v2504_v59, 0.0  ;;  %vm840_vm15 = vcmp.eq.s32.totalorder %v3375_v37, %v2519_v5  ;;  %vm842_vm0 = vcmp.eq.s32.totalorder %v3376_v1, %v2519_v5  ;;  %v3383_v49 = vld [vmem:[#allocation15_spill] sm:$0xff] }
 0x506   : > { %v1393_v52 = vmul.f32 %v1329_v23, %v977_v34  ;;  %v912_v53 = vsel %vm840_vm15, %v2489_v60, 0.0  ;;  %v914_v40 = vsel %vm842_vm0, %v2489_v60, 0.0  ;;  %vm1048_vm1 = vcmp.eq.s32.totalorder %v3377_v44, %v2507_v4 }
 0x507   : > { %v1395_v15 = vmul.f32 %v1331_v10, %v979_v29  ;;  %v976_v41 = vadd.f32 %v912_v53, %v768_v50  ;;  %v978_v16 = vadd.f32 %v914_v40, %v770_v32  ;;  %vm1050_vm2 = vcmp.eq.s32.totalorder %v3378_v0, %v2507_v4 }
 0x508   : > { %v1120_v46 = vsel %vm1048_vm1, %v2510_v2, 0.0  ;;  %v1122_v48 = vsel %vm1050_vm2, %v2510_v2, 0.0  ;;  %vm1192_vm3 = vcmp.eq.s32.totalorder %v3377_v44, %v2522_v14  ;;  %vm1194_vm4 = vcmp.eq.s32.totalorder %v3378_v0, %v2522_v14 }
 0x509   : > { %v1778_v19 = vpack.c.bf16 %v1395_v15, %v1393_v52  ;;  %v1264_v20 = vsel %vm1192_vm3, %v2492_v17, 0.0  ;;  %v1266_v11 = vsel %vm1194_vm4, %v2492_v17, 0.0  ;;  %vm701_vm5 = vcmp.eq.s32.totalorder %v3379_v12, %v2513_v6 }
 0x50a   : > { %v1328_v39 = vadd.f32 %v1264_v20, %v1120_v46  ;;  %v1330_v42 = vadd.f32 %v1266_v11, %v1122_v48  ;;  %vm703_vm6 = vcmp.eq.s32.totalorder %v3380_v26, %v2513_v6  ;;  %v773_v27 = vsel %vm701_vm5, %v2516_v9, 0.0 }
 0x50b   : > { %1779 = vmatprep.subr.bf16.mxu1 %v1778_v19  ;;  %v775_v61 = vsel %vm703_vm6, %v2516_v9, 0.0  ;;  %vm845_vm7 = vcmp.eq.s32.totalorder %v3379_v12, %v2531_v18  ;;  %vm847_vm8 = vcmp.eq.s32.totalorder %v3380_v26, %v2531_v18  ;;  %vm1053_vm9 = vcmp.eq.s32.totalorder %v3381_v62, %v2525_v13 }
 0x50c   : > { %v1392_v51 = vmul.f32 %v1328_v39, %v976_v41  ;;  %v1394_v7 = vmul.f32 %v1330_v42, %v978_v16  ;;  %v917_v8 = vsel %vm845_vm7, %v2495_v43, 0.0  ;;  %v919_v36 = vsel %vm847_vm8, %v2495_v43, 0.0 }
 0x50d   : > { %v981_v38 = vadd.f32 %v917_v8, %v773_v27  ;;  %v983_v37 = vadd.f32 %v919_v36, %v775_v61  ;;  %vm1055_vm10 = vcmp.eq.s32.totalorder %v3382_v22, %v2525_v13  ;;  %v1125_v31 = vsel %vm1053_vm9, %v2528_v28, 0.0 }
 0x50e   : > { %v1780_v1 = vpack.c.bf16 %v1394_v7, %v1392_v51  ;;  %v1127_v3 = vsel %vm1055_vm10, %v2528_v28, 0.0  ;;  %vm1197_vm11 = vcmp.eq.s32.totalorder %v3381_v62, %v2534_v47  ;;  %vm1199_vm12 = vcmp.eq.s32.totalorder %v3382_v22, %v2534_v47 }
 0x50f   : > { %v1269_v21 = vsel %vm1197_vm11, %v2498_v35, 0.0  ;;  %v1271_v30 = vsel %vm1199_vm12, %v2498_v35, 0.0  ;;  %vm700_vm13 = vcmp.eq.s32.totalorder %v3379_v12, %v2501_v56  ;;  %vm702_vm14 = vcmp.eq.s32.totalorder %v3380_v26, %v2501_v56 }
 0x510   : > { %1781 = vmatpush1.bf16.msra.mxu1 %v1780_v1  ;;  %v1333_v33 = vadd.f32 %v1269_v21, %v1125_v31  ;;  %v1335_v63 = vadd.f32 %v1271_v30, %v1127_v3  ;;  %v772_v44 = vsel %vm700_vm13, %v2504_v59, 0.0  ;;  %v774_v0 = vsel %vm702_vm14, %v2504_v59, 0.0 }
 0x511   : > { %vm844_vm15 = vcmp.eq.s32.totalorder %v3379_v12, %v2519_v5  ;;  %vm846_vm0 = vcmp.eq.s32.totalorder %v3380_v26, %v2519_v5  ;;  %vm1052_vm1 = vcmp.eq.s32.totalorder %v3381_v62, %v2507_v4  ;;  %vm1054_vm2 = vcmp.eq.s32.totalorder %v3382_v22, %v2507_v4 }
 0x512   : > { %v1397_v45 = vmul.f32 %v1333_v33, %v981_v38  ;;  %v1399_v24 = vmul.f32 %v1335_v63, %v983_v37  ;;  %v916_v25 = vsel %vm844_vm15, %v2489_v60, 0.0  ;;  %v918_v34 = vsel %vm846_vm0, %v2489_v60, 0.0 }
 0x513   : > { %v980_v29 = vadd.f32 %v916_v25, %v772_v44  ;;  %v982_v54 = vadd.f32 %v918_v34, %v774_v0  ;;  %v1124_v57 = vsel %vm1052_vm1, %v2510_v2, 0.0  ;;  %v1126_v58 = vsel %vm1054_vm2, %v2510_v2, 0.0 }
 0x514   : > { %v1782_v55 = vpack.c.bf16 %v1399_v24, %v1397_v45  ;;  %vm1196_vm3 = vcmp.eq.s32.totalorder %v3381_v62, %v2522_v14  ;;  %vm1198_vm4 = vcmp.eq.s32.totalorder %v3382_v22, %v2522_v14  ;;  %v576_v23 = vadd.s32 192, %v3383_v49 }
 0x515   : > { %v1268_v50 = vsel %vm1196_vm3, %v2492_v17, 0.0  ;;  %v1270_v10 = vsel %vm1198_vm4, %v2492_v17, 0.0  ;;  %v577_v32 = vadd.s32 200, %v3383_v49  ;;  %v578_v52 = vadd.s32 208, %v3383_v49 }
 0x516   : > { %1783 = vmatprep.subr.bf16.mxu1 %v1782_v55  ;;  %v1332_v53 = vadd.f32 %v1268_v50, %v1124_v57  ;;  %v1334_v40 = vadd.f32 %v1270_v10, %v1126_v58  ;;  %v608_v15 = vshra.s32 %v576_v23, 4  ;;  %v640_v41 = vand.u32 15, %v576_v23 }
 0x517   : > { %v609_v16 = vshra.s32 %v577_v32, 4  ;;  %v641_v46 = vand.u32 15, %v577_v32  ;;  %v579_v48 = vadd.s32 216, %v3383_v49  ;;  %v3116_v19 = vshra.s32 %v578_v52, 4 }
 0x518   : > { %v1396_v20 = vmul.f32 %v1332_v53, %v980_v29  ;;  %v1398_v11 = vmul.f32 %v1334_v40, %v982_v54  ;;  %vm705_vm5 = vcmp.eq.s32.totalorder %v640_v41, %v2513_v6  ;;  %vm849_vm6 = vcmp.eq.s32.totalorder %v640_v41, %v2531_v18 }
 0x519   : > { %vm707_vm7 = vcmp.eq.s32.totalorder %v641_v46, %v2513_v6  ;;  %v777_v12 = vsel %vm705_vm5, %v2516_v9, 0.0  ;;  %vm851_vm8 = vcmp.eq.s32.totalorder %v641_v46, %v2531_v18  ;;  %v921_v39 = vsel %vm849_vm6, %v2495_v43, 0.0 }
 0x51a   : > { %v1784_v42 = vpack.c.bf16 %v1398_v11, %v1396_v20  ;;  %v779_v26 = vsel %vm707_vm7, %v2516_v9, 0.0  ;;  %v923_v27 = vsel %vm851_vm8, %v2495_v43, 0.0  ;;  %v985_v61 = vadd.f32 %v921_v39, %v777_v12 }
 0x51b   : > { %v987_v62 = vadd.f32 %v923_v27, %v779_v26  ;;  %vm1057_vm9 = vcmp.eq.s32.totalorder %v608_v15, %v2525_v13  ;;  %vm1059_vm10 = vcmp.eq.s32.totalorder %v609_v16, %v2525_v13  ;;  %vm1201_vm11 = vcmp.eq.s32.totalorder %v608_v15, %v2534_v47 }
 0x51c   : > { %1785 = vmatpush1.bf16.msra.mxu1 %v1784_v42  ;;  %v1129_v51 = vsel %vm1057_vm9, %v2528_v28, 0.0  ;;  %v1131_v7 = vsel %vm1059_vm10, %v2528_v28, 0.0  ;;  %vm1203_vm12 = vcmp.eq.s32.totalorder %v609_v16, %v2534_v47  ;;  %v1273_v8 = vsel %vm1201_vm11, %v2498_v35, 0.0 }
 0x51d   : > { %v1275_v36 = vsel %vm1203_vm12, %v2498_v35, 0.0  ;;  %v1337_v38 = vadd.f32 %v1273_v8, %v1129_v51  ;;  %vm704_vm13 = vcmp.eq.s32.totalorder %v640_v41, %v2501_v56  ;;  %vm706_vm14 = vcmp.eq.s32.totalorder %v641_v46, %v2501_v56 }
 0x51e   : > { %v1339_v37 = vadd.f32 %v1275_v36, %v1131_v7  ;;  %v776_v22 = vsel %vm704_vm13, %v2504_v59, 0.0  ;;  %v778_v31 = vsel %vm706_vm14, %v2504_v59, 0.0  ;;  %vm848_vm15 = vcmp.eq.s32.totalorder %v640_v41, %v2519_v5 }
 0x51f   : > { %v1401_v1 = vmul.f32 %v1337_v38, %v985_v61  ;;  %vm850_vm0 = vcmp.eq.s32.totalorder %v641_v46, %v2519_v5  ;;  %v920_v3 = vsel %vm848_vm15, %v2489_v60, 0.0  ;;  %vm1056_vm1 = vcmp.eq.s32.totalorder %v608_v15, %v2507_v4 }
 0x520   : > { %v1403_v21 = vmul.f32 %v1339_v37, %v987_v62  ;;  %v922_v30 = vsel %vm850_vm0, %v2489_v60, 0.0  ;;  %v984_v33 = vadd.f32 %v920_v3, %v776_v22  ;;  %vm1058_vm2 = vcmp.eq.s32.totalorder %v609_v16, %v2507_v4 }
 0x521   : > { %v986_v63 = vadd.f32 %v922_v30, %v778_v31  ;;  %v1128_v44 = vsel %vm1056_vm1, %v2510_v2, 0.0  ;;  %v1130_v0 = vsel %vm1058_vm2, %v2510_v2, 0.0  ;;  %vm1200_vm3 = vcmp.eq.s32.totalorder %v608_v15, %v2522_v14 }
 0x522   : > { %v1786_v45 = vpack.c.bf16 %v1403_v21, %v1401_v1  ;;  %vm1202_vm4 = vcmp.eq.s32.totalorder %v609_v16, %v2522_v14  ;;  %v1272_v24 = vsel %vm1200_vm3, %v2492_v17, 0.0  ;;  %v611_v25 = vshra.s32 %v579_v48, 4 }
 0x523   : > { %v1274_v34 = vsel %vm1202_vm4, %v2492_v17, 0.0  ;;  %v1336_v29 = vadd.f32 %v1272_v24, %v1128_v44  ;;  %v642_v54 = vand.u32 15, %v578_v52  ;;  %v643_v57 = vand.u32 15, %v579_v48 }
 0x524   : > { %1787 = vmatprep.subr.bf16.mxu1 %v1786_v45  ;;  %v1338_v58 = vadd.f32 %v1274_v34, %v1130_v0  ;;  %vm1061_vm5 = vcmp.eq.s32.totalorder %v3116_v19, %v2525_v13  ;;  %vm1063_vm6 = vcmp.eq.s32.totalorder %v611_v25, %v2525_v13  ;;  %vm1205_vm7 = vcmp.eq.s32.totalorder %v3116_v19, %v2534_v47 }
 0x525   : > { %v1400_v55 = vmul.f32 %v1336_v29, %v984_v33  ;;  %vm709_vm8 = vcmp.eq.s32.totalorder %v642_v54, %v2513_v6  ;;  %vm711_vm9 = vcmp.eq.s32.totalorder %v643_v57, %v2513_v6  ;;  %vm853_vm10 = vcmp.eq.s32.totalorder %v642_v54, %v2531_v18 }
 0x526   : > { %v1402_v23 = vmul.f32 %v1338_v58, %v986_v63  ;;  %v781_v50 = vsel %vm709_vm8, %v2516_v9, 0.0  ;;  %v783_v10 = vsel %vm711_vm9, %v2516_v9, 0.0  ;;  %vm855_vm11 = vcmp.eq.s32.totalorder %v643_v57, %v2531_v18 }
 0x527   : > { %v925_v32 = vsel %vm853_vm10, %v2495_v43, 0.0  ;;  %v927_v52 = vsel %vm855_vm11, %v2495_v43, 0.0  ;;  %v1133_v53 = vsel %vm1061_vm5, %v2528_v28, 0.0  ;;  %v1135_v40 = vsel %vm1063_vm6, %v2528_v28, 0.0 }
 0x528   : > { %v1788_v15 = vpack.c.bf16 %v1402_v23, %v1400_v55  ;;  %v989_v41 = vadd.f32 %v925_v32, %v781_v50  ;;  %v991_v16 = vadd.f32 %v927_v52, %v783_v10  ;;  %vm1207_vm12 = vcmp.eq.s32.totalorder %v611_v25, %v2534_v47 }
 0x529   : > { %v1277_v46 = vsel %vm1205_vm7, %v2498_v35, 0.0  ;;  %v1279_v48 = vsel %vm1207_vm12, %v2498_v35, 0.0  ;;  %vm708_vm13 = vcmp.eq.s32.totalorder %v642_v54, %v2501_v56  ;;  %vm710_vm14 = vcmp.eq.s32.totalorder %v643_v57, %v2501_v56 }
 0x52a   : > { %1789 = vmatpush1.bf16.msra.mxu1 %v1788_v15  ;;  %v1341_v20 = vadd.f32 %v1277_v46, %v1133_v53  ;;  %v1343_v11 = vadd.f32 %v1279_v48, %v1135_v40  ;;  %v780_v12 = vsel %vm708_vm13, %v2504_v59, 0.0  ;;  %v782_v39 = vsel %vm710_vm14, %v2504_v59, 0.0 }
 0x52b   : > { %vm852_vm15 = vcmp.eq.s32.totalorder %v642_v54, %v2519_v5  ;;  %vm854_vm0 = vcmp.eq.s32.totalorder %v643_v57, %v2519_v5  ;;  %vm1060_vm1 = vcmp.eq.s32.totalorder %v3116_v19, %v2507_v4  ;;  %vm1062_vm2 = vcmp.eq.s32.totalorder %v611_v25, %v2507_v4 }
 0x52c   : > { %v1405_v42 = vmul.f32 %v1341_v20, %v989_v41  ;;  %v1407_v26 = vmul.f32 %v1343_v11, %v991_v16  ;;  %v924_v27 = vsel %vm852_vm15, %v2489_v60, 0.0  ;;  %v926_v61 = vsel %vm854_vm0, %v2489_v60, 0.0 }
 0x52d   : > { %v988_v62 = vadd.f32 %v924_v27, %v780_v12  ;;  %v990_v51 = vadd.f32 %v926_v61, %v782_v39  ;;  %v1132_v7 = vsel %vm1060_vm1, %v2510_v2, 0.0  ;;  %v1134_v8 = vsel %vm1062_vm2, %v2510_v2, 0.0 }
 0x52e   : > { %v1790_v36 = vpack.c.bf16 %v1407_v26, %v1405_v42  ;;  %vm1204_vm3 = vcmp.eq.s32.totalorder %v3116_v19, %v2522_v14  ;;  %vm1206_vm4 = vcmp.eq.s32.totalorder %v611_v25, %v2522_v14  ;;  %v580_v38 = vadd.s32 224, %v3383_v49 }
 0x52f   : > { %v1276_v37 = vsel %vm1204_vm3, %v2492_v17, 0.0  ;;  %v1278_v22 = vsel %vm1206_vm4, %v2492_v17, 0.0  ;;  %v581_v31 = vadd.s32 232, %v3383_v49  ;;  %v582_v1 = vadd.s32 240, %v3383_v49 }
 0x530   : > { %1791 = vmatprep.subr.bf16.mxu1 %v1790_v36  ;;  %v1340_v3 = vadd.f32 %v1276_v37, %v1132_v7  ;;  %v1342_v21 = vadd.f32 %v1278_v22, %v1134_v8  ;;  %v612_v30 = vshra.s32 %v580_v38, 4  ;;  %v644_v33 = vand.u32 15, %v580_v38 }
 0x531   : > { %v613_v63 = vshra.s32 %v581_v31, 4  ;;  %v645_v44 = vand.u32 15, %v581_v31  ;;  %v583_v19 = vadd.s32 248, %v3383_v49  ;;  %v3193_v0 = vshra.s32 %v582_v1, 4 }
 0x532   : > { %v1404_v45 = vmul.f32 %v1340_v3, %v988_v62  ;;  %v1406_v24 = vmul.f32 %v1342_v21, %v990_v51  ;;  %vm713_vm5 = vcmp.eq.s32.totalorder %v644_v33, %v2513_v6  ;;  %vm857_vm6 = vcmp.eq.s32.totalorder %v644_v33, %v2531_v18 }
 0x533   : > { %vm715_vm7 = vcmp.eq.s32.totalorder %v645_v44, %v2513_v6  ;;  %v785_v25 = vsel %vm713_vm5, %v2516_v9, 0.0  ;;  %vm859_vm8 = vcmp.eq.s32.totalorder %v645_v44, %v2531_v18  ;;  %v929_v34 = vsel %vm857_vm6, %v2495_v43, 0.0 }
 0x534   : > { %v1792_v29 = vpack.c.bf16 %v1406_v24, %v1404_v45  ;;  %v787_v54 = vsel %vm715_vm7, %v2516_v9, 0.0  ;;  %v931_v49 = vsel %vm859_vm8, %v2495_v43, 0.0  ;;  %v993_v57 = vadd.f32 %v929_v34, %v785_v25 }
 0x535   : > { %v995_v58 = vadd.f32 %v931_v49, %v787_v54  ;;  %vm1065_vm9 = vcmp.eq.s32.totalorder %v612_v30, %v2525_v13  ;;  %vm1067_vm10 = vcmp.eq.s32.totalorder %v613_v63, %v2525_v13  ;;  %vm1209_vm11 = vcmp.eq.s32.totalorder %v612_v30, %v2534_v47 }
 0x536   : > { %1793 = vmatpush1.bf16.msra.mxu1 %v1792_v29  ;;  %v1137_v55 = vsel %vm1065_vm9, %v2528_v28, 0.0  ;;  %v1139_v23 = vsel %vm1067_vm10, %v2528_v28, 0.0  ;;  %vm1211_vm12 = vcmp.eq.s32.totalorder %v613_v63, %v2534_v47  ;;  %v1281_v50 = vsel %vm1209_vm11, %v2498_v35, 0.0 }
 0x537   : > { %v1283_v10 = vsel %vm1211_vm12, %v2498_v35, 0.0  ;;  %v1345_v32 = vadd.f32 %v1281_v50, %v1137_v55  ;;  %vm712_vm13 = vcmp.eq.s32.totalorder %v644_v33, %v2501_v56  ;;  %vm714_vm14 = vcmp.eq.s32.totalorder %v645_v44, %v2501_v56 }
 0x538   : > { %v1347_v52 = vadd.f32 %v1283_v10, %v1139_v23  ;;  %v784_v53 = vsel %vm712_vm13, %v2504_v59, 0.0  ;;  %v786_v40 = vsel %vm714_vm14, %v2504_v59, 0.0  ;;  %vm856_vm15 = vcmp.eq.s32.totalorder %v644_v33, %v2519_v5 }
 0x539   : > { %v1409_v15 = vmul.f32 %v1345_v32, %v993_v57  ;;  %vm858_vm0 = vcmp.eq.s32.totalorder %v645_v44, %v2519_v5  ;;  %v928_v41 = vsel %vm856_vm15, %v2489_v60, 0.0  ;;  %vm1064_vm1 = vcmp.eq.s32.totalorder %v612_v30, %v2507_v4 }
 0x53a   : > { %v1411_v16 = vmul.f32 %v1347_v52, %v995_v58  ;;  %v930_v46 = vsel %vm858_vm0, %v2489_v60, 0.0  ;;  %v992_v48 = vadd.f32 %v928_v41, %v784_v53  ;;  %vm1066_vm2 = vcmp.eq.s32.totalorder %v613_v63, %v2507_v4 }
 0x53b   : > { %v994_v20 = vadd.f32 %v930_v46, %v786_v40  ;;  %v1136_v11 = vsel %vm1064_vm1, %v2510_v2, 0.0  ;;  %v1138_v12 = vsel %vm1066_vm2, %v2510_v2, 0.0  ;;  %vm1208_vm3 = vcmp.eq.s32.totalorder %v612_v30, %v2522_v14 }
 0x53c   : > { %v1794_v39 = vpack.c.bf16 %v1411_v16, %v1409_v15  ;;  %vm1210_vm4 = vcmp.eq.s32.totalorder %v613_v63, %v2522_v14  ;;  %v1280_v42 = vsel %vm1208_vm3, %v2492_v17, 0.0  ;;  %v615_v26 = vshra.s32 %v583_v19, 4 }
 0x53d   : > { %v1282_v27 = vsel %vm1210_vm4, %v2492_v17, 0.0  ;;  %v1344_v61 = vadd.f32 %v1280_v42, %v1136_v11  ;;  %v646_v62 = vand.u32 15, %v582_v1  ;;  %v647_v51 = vand.u32 15, %v583_v19 }
 0x53e   : > { %1795 = vmatprep.subr.bf16.mxu1 %v1794_v39  ;;  %v1346_v7 = vadd.f32 %v1282_v27, %v1138_v12  ;;  %vm1069_vm5 = vcmp.eq.s32.totalorder %v3193_v0, %v2525_v13  ;;  %vm1071_vm6 = vcmp.eq.s32.totalorder %v615_v26, %v2525_v13  ;;  %vm1213_vm7 = vcmp.eq.s32.totalorder %v3193_v0, %v2534_v47 }
 0x53f   : > { %v1408_v8 = vmul.f32 %v1344_v61, %v992_v48  ;;  %vm717_vm8 = vcmp.eq.s32.totalorder %v646_v62, %v2513_v6  ;;  %vm719_vm9 = vcmp.eq.s32.totalorder %v647_v51, %v2513_v6  ;;  %vm861_vm10 = vcmp.eq.s32.totalorder %v646_v62, %v2531_v18 }
 0x540   : > { %v1410_v36 = vmul.f32 %v1346_v7, %v994_v20  ;;  %v789_v38 = vsel %vm717_vm8, %v2516_v9, 0.0  ;;  %v791_v37 = vsel %vm719_vm9, %v2516_v9, 0.0  ;;  %vm863_vm11 = vcmp.eq.s32.totalorder %v647_v51, %v2531_v18 }
 0x541   : > { %v933_v22 = vsel %vm861_vm10, %v2495_v43, 0.0  ;;  %v935_v13 = vsel %vm863_vm11, %v2495_v43, 0.0  ;;  %v1141_v31 = vsel %vm1069_vm5, %v2528_v28, 0.0  ;;  %v1143_v1 = vsel %vm1071_vm6, %v2528_v28, 0.0 }
 0x542   : > { %v1796_v3 = vpack.c.bf16 %v1410_v36, %v1408_v8  ;;  %v997_v21 = vadd.f32 %v933_v22, %v789_v38  ;;  %v999_v6 = vadd.f32 %v935_v13, %v791_v37  ;;  %vm1215_vm12 = vcmp.eq.s32.totalorder %v615_v26, %v2534_v47  ;;  %v1416_v47 = vld [vmem:[%s2344_s9] sm:$0xff] }
 0x543   : > { %v1285_v9 = vsel %vm1213_vm7, %v2498_v35, 0.0  ;;  %v1287_v18 = vsel %vm1215_vm12, %v2498_v35, 0.0  ;;  %vm716_vm13 = vcmp.eq.s32.totalorder %v646_v62, %v2501_v56  ;;  %vm718_vm14 = vcmp.eq.s32.totalorder %v647_v51, %v2501_v56 }
 0x544   : > { %1797 = vmatpush1.bf16.msra.mxu1 %v1796_v3  ;;  %v1349_v43 = vadd.f32 %v1285_v9, %v1141_v31  ;;  %v1351_v28 = vadd.f32 %v1287_v18, %v1143_v1  ;;  %v788_v30 = vsel %vm716_vm13, %v2504_v59, 0.0  ;;  %v790_v33 = vsel %vm718_vm14, %v2504_v59, 0.0 }
 0x545   : > { %vm860_vm15 = vcmp.eq.s32.totalorder %v646_v62, %v2519_v5  ;;  %vm862_vm0 = vcmp.eq.s32.totalorder %v647_v51, %v2519_v5  ;;  %vm1068_vm1 = vcmp.eq.s32.totalorder %v3193_v0, %v2507_v4  ;;  %vm1070_vm2 = vcmp.eq.s32.totalorder %v615_v26, %v2507_v4 }
 0x546   : > { %v1413_v35 = vmul.f32 %v1349_v43, %v997_v21  ;;  %v1415_v63 = vmul.f32 %v1351_v28, %v999_v6  ;;  %v932_v56 = vsel %vm860_vm15, %v2489_v60, 0.0  ;;  %v934_v44 = vsel %vm862_vm0, %v2489_v60, 0.0 }
 0x547   : > { %v996_v19 = vadd.f32 %v932_v56, %v788_v30  ;;  %v998_v45 = vadd.f32 %v934_v44, %v790_v33  ;;  %vm1212_vm3 = vcmp.eq.s32.totalorder %v3193_v0, %v2522_v14  ;;  %vm1214_vm4 = vcmp.eq.s32.totalorder %v615_v26, %v2522_v14 }
 0x548   : > { %v1798_v24 = vpack.c.bf16 %v1415_v63, %v1413_v35  ;;  %v1418_v5 = vcombine.high %v1416_v47, %v1416_v47  ;;  %v1140_v59 = vsel %vm1068_vm1, %v2510_v2, 0.0  ;;  %v1142_v4 = vsel %vm1070_vm2, %v2510_v2, 0.0 }
 0x549   : > { %v1284_v25 = vsel %vm1212_vm3, %v2492_v17, 0.0  ;;  %v1286_v34 = vsel %vm1214_vm4, %v2492_v17, 0.0 }
 0x54a   : > { %1799 = vmatprep.subr.bf16.mxu1 %v1798_v24  ;;  %v1348_v60 = vadd.f32 %v1284_v25, %v1140_v59  ;;  %v1350_v29 = vadd.f32 %v1286_v34, %v1142_v4  ;;  %1484 = vmatprep.mubr.f32.mxu1 %v1418_v5 }
 0x54c   : > { %v1412_v54 = vmul.f32 %v1348_v60, %v996_v19  ;;  %v1414_v0 = vmul.f32 %v1350_v29, %v998_v45 }
 0x54e   : > { %v1800_v49 = vpack.c.bf16 %v1414_v0, %v1412_v54 }
 0x550   : > { %1801 = vmatpush1.bf16.msra.mxu1 %v1800_v49 }
 0x553   : > { %1485 = vmatmul.mubr.f32.vlgmr.msra.gmra.mrb[0].mxu1 %v1416_v47 }
 0x626   : > { %v1486_v14 = vpop.f32.mrb[0].mxu1 }
 0x627   : > { %v1488_v2 = vpop.f32.mrb[1].mxu1 }
 0x628   : > { %v1493_v57 = vcombine.low %v1486_v14, %v1488_v2 }
 0x62a   : > { %1495 = vst [vmem:[%s303_s14] sm:$0xff] %v1493_v57 }
 0x62b   : > { %2018 = shalt.err (!%p2015_p7)
}
 0x62c   : > { %s2019_s7 = scalar_lea.hbm %s3273_s6, 128  ;;  %s2023_s24 = scalar_lea.hbm %s3322_s5, 256 }
 0x62d   : > { %p2020_p3 = scmp.ne.s32.totalorder %s3273_s6, %s2019_s7  ;;  %p2024_p0 = scmp.lt.u32.totalorder %s3273_s6, %s3322_s5 }
 0x62e   : > { %p2025_p8 = scmp.lt.u32.totalorder %s2023_s24, %s2019_s7  ;;  %p2027_p9 = scmp.lt.u32.totalorder %s2019_s7, %s3273_s6 }
 0x62f   : > { %p2021_p5 = pnand %p2020_p3, %p3384_p12 }
 0x630   : > { %p2026_p11 = por %p2025_p8, %p2024_p0 }
 0x631   : > { %p2022_p1 = pneg %p2021_p5 }
 0x632   : > { %p2028_p2 = por %p2027_p9, %p2026_p11 }
 0x634   : > { %p2029_p13 = pnand %p2028_p2, %p2022_p1 }
 0x636   : > { %2032 = shalt.err (!%p2029_p13)
}
 0x637   : > { %1818 = dma.vmem_to_hbm [thread:$0]  (%p3384_p12), %s3275_s15, 128, %s3273_s6, %s1497_s10  }
 0x638 PF: > { %s1523_s13 = sand.u32 1, %s2067_s18   ;;  %p3385_p6 = scmp.ne.s32.totalorder %s3344_s25, 0 }
 0x639   : > { %p3386_p10 = scmp.ge.s32.totalorder %s2079_s21, 2  ;;  %s1524_s14 = scalar_lea.sflag [#allocation4], %s1523_s13 }
 0x63b   : > { %p1835_p4 = pnand %p3386_p10, %p3385_p6 }
 0x63d   : > { %2062 = dma.done.wait (!%p1835_p4), %s1524_s14, 128  }
 0x63e   : > { %2064 = vsyncadd (!%p1835_p4), %s1524_s14, 4294967168  ;;  %p22_p7 = scmp.ge.s32.totalorder %s2234_s16, 4   ;;  %s3387_s18 = smov %s2071_s19 }
 0x63f   : > { %s3388_s19 = smov %s2075_s20  ;;  %s3389_s20 = smov %s2243_s27 }
 0x640   : > { %s3390_s21 = smov %s2234_s16  ;;  %24 = sbr.rel (!%p22_p7) target bundleno = 8 (0x8), region = 106 }
 0x647   :  { %1529 = vsyncpa [#allocation3], 1 }
 0x648   :  { %1531 = vsyncpa [#allocation3 + $0x1], 1 }
 0x649   :  { %1532 = vsyncpa [#allocation6], 1 }
 0x64a   :  { %1533 = vsyncpa [#allocation9], 1 }
 0x64b   :  { %1535 = vsyncpa [#allocation9 + $0x1], 1 }
 0x64c   :  { %1536 = vsyncpa [#allocation4], 1 }
 0x64d   :  { %1538 = vsyncpa [#allocation4 + $0x1], 1 }

</bundles_post_ra>
